<compile_context>
chip_gen: v5e
topology: v5e:2x2
jax: 0.10.0
libtpu: 0.0.40
codegen_flags: <defaults>
</compile_context>

<pallas_src>
import jax
import jax.numpy as jnp
from jax.experimental import pallas as pl
from jax.experimental.pallas import tpu as pltpu


def _reorder_gates(m, axis=0):
    """torch LSTM gate order (i, f, g, o) -> (i, f, o, g): sigmoid gates contiguous."""
    i, f, g, o = jnp.split(m, 4, axis=axis)
    return jnp.concatenate([i, f, o, g], axis=axis)


# ----------------------------- Pallas kernel -------------------------------

def lstm_kernel(tok_ref, emb_gates_ref, whh_ref, wlab_ref, blab_ref,
                y_ref, g_sc):
    """Single-launch LSTM classification.

    tok_ref       : (S*B, 1) int32  time-major flattened token ids (batch padded)
    emb_gates_ref : (Vp, 4H) bf16   emb @ W_ih^T + (b_ih + b_hh), order (i,f,o,g), V padded
    whh_ref       : (H, 4H)  bf16   W_hh^T, gate order (i,f,o,g)
    wlab_ref      : (H, OUTP) f32   hidden2label weight^T, lane-padded to 128
    blab_ref      : (1, OUTP) f32   hidden2label bias, lane-padded
    y_ref         : (B, OUTP) f32   logits (padded)
    g_sc          : (S*B, 4H) f32   VMEM scratch for the pre-computed input gates
    """
    SB = tok_ref.shape[0]
    VP = emb_gates_ref.shape[0]
    H = whh_ref.shape[0]
    B = y_ref.shape[0]
    S = SB // B

    # Fused embedding gather + input projection + gate bias as ONE bf16 MXU matmul
    # with f32 accumulation (one-hot is exact in bf16).
    tok = tok_ref[...]                                               # (S*B, 1)
    vocab_ids = jax.lax.broadcasted_iota(jnp.int32, (SB, VP), 1)     # (S*B, Vp)
    one_hot = jnp.where(vocab_ids == tok, 1.0, 0.0).astype(jnp.bfloat16)
    g_sc[...] = jnp.dot(one_hot, emb_gates_ref[...],
                        preferred_element_type=jnp.float32)          # (S*B, 4H) f32

    h = jnp.zeros((B, H), jnp.float32)
    c = jnp.zeros((B, H), jnp.float32)

    # Fully unrolled recurrence (S is small & static). Only the bf16
    # (B,H)x(H,4H) matmul + one sigmoid pass + two tanh passes sit on the
    # serial critical path; all slices are vreg-aligned (128-lane multiples).
    for t in range(S):
        gates = g_sc[t * B:(t + 1) * B, :]                           # (B, 4H) f32
        # bf16 operands, f32 accumulation; written accumulate-into so v7x MRB
        # can absorb the add.
        gates += jnp.dot(h.astype(jnp.bfloat16), whh_ref[...],
                         preferred_element_type=jnp.float32)
        ifo = jax.nn.sigmoid(gates[:, :3 * H])                       # one EUP pass (f32)
        g_g = jnp.tanh(gates[:, 3 * H:])                             # one EUP pass (f32)
        c = ifo[:, H:2 * H] * c + ifo[:, :H] * g_g
        h = ifo[:, 2 * H:] * jnp.tanh(c)

    # final = lstm_out[-1]  (lstm_reduce_by_mean is True, not the string 'mean').
    # Head matmul stays f32 (tiny, off the hot loop).
    y_ref[...] = (jnp.dot(h, wlab_ref[...], preferred_element_type=jnp.float32)
                  + blab_ref[...]).astype(y_ref.dtype)


# -------------------------------- wrapper -----------------------------------

def lstm_classification_forward(tokens, params):
    """tokens: (B, S) int32 ids.  Returns logits (B, out_features)."""
    emb     = params["embedding"]                   # (V, E)
    w_ih    = params["w_ih"]                        # (4H, E)  torch layout
    w_hh    = params["w_hh"]                        # (4H, H)
    bias    = params["b_ih"] + params["b_hh"]       # (4H,)
    w_label = params["w_label"]                     # (OUT, H)
    b_label = params["b_label"]                     # (OUT,)

    B, S = tokens.shape
    V, E = emb.shape
    H = w_hh.shape[1]
    OUT = w_label.shape[0]

    B_pad = ((B + 7) // 8) * 8              # sublane multiple (vreg height)
    V_pad = ((V + 7) // 8) * 8              # clean sublane layout / aligned K
    OUT_PAD = ((OUT + 127) // 128) * 128    # lane-dense output store

    # Weight-only layout plumbing (constant-folded / hoisted under jit):
    # gate reorder + fold embedding lookup, input projection and gate bias into
    # one table, pad V, then cast the two hot-path operands to bf16.
    w_ih_r = _reorder_gates(w_ih)           # (4H, E)
    w_hh_r = _reorder_gates(w_hh)           # (4H, H)
    bias_r = _reorder_gates(bias)           # (4H,)
    emb_gates = emb @ w_ih_r.T + bias_r     # (V, 4H) f32
    emb_gates_p = (jnp.zeros((V_pad, 4 * H), jnp.float32)
                   .at[:V, :].set(emb_gates)
                   .astype(jnp.bfloat16))   # (Vp, 4H) bf16
    whh_t = w_hh_r.T.astype(jnp.bfloat16)   # (H, 4H)  bf16

    wlab_t = jnp.zeros((H, OUT_PAD), jnp.float32).at[:, :OUT].set(w_label.T)
    blab = jnp.zeros((1, OUT_PAD), jnp.float32).at[0, :OUT].set(b_label)

    # Pad batch to 8 sublanes, go time-major, flatten to (S*B_pad, 1).
    tok_pad = jnp.zeros((B_pad, S), jnp.int32).at[:B, :].set(tokens)
    tok_flat = tok_pad.T.reshape(S * B_pad, 1)

    cost = pl.CostEstimate(
        flops=(2 * S * B_pad * V_pad * 4 * H      # one-hot gather/projection
               + 2 * S * B_pad * H * 4 * H        # recurrence
               + 2 * B_pad * H * OUT_PAD),        # classification head
        transcendentals=S * B_pad * 5 * H,
        bytes_accessed=(4 * S * B_pad                       # tokens
                        + 2 * (V_pad * 4 * H + H * 4 * H)   # bf16 tables
                        + 4 * (H * OUT_PAD + OUT_PAD + B_pad * OUT_PAD)),
    )

    y_pad = pl.pallas_call(
        lstm_kernel,
        out_shape=jax.ShapeDtypeStruct((B_pad, OUT_PAD), jnp.float32),
        grid_spec=pltpu.PrefetchScalarGridSpec(
            num_scalar_prefetch=0,
            grid=(1,),                                        # single launch
            in_specs=[
                pl.BlockSpec((S * B_pad, 1),  lambda i: (0, 0)),   # token ids
                pl.BlockSpec((V_pad, 4 * H),  lambda i: (0, 0)),   # emb@W_ih^T + b (bf16)
                pl.BlockSpec((H, 4 * H),      lambda i: (0, 0)),   # W_hh^T (bf16)
                pl.BlockSpec((H, OUT_PAD),    lambda i: (0, 0)),   # W_label^T (padded)
                pl.BlockSpec((1, OUT_PAD),    lambda i: (0, 0)),   # b_label (padded)
            ],
            out_specs=pl.BlockSpec((B_pad, OUT_PAD), lambda i: (0, 0)),
            scratch_shapes=[pltpu.VMEM((S * B_pad, 4 * H), jnp.float32)],
        ),
        compiler_params=pltpu.CompilerParams(
            dimension_semantics=("arbitrary",),
        ),
        cost_estimate=cost,
    )(tok_flat, emb_gates_p, whh_t, wlab_t, blab)

    return y_pad[:B, :OUT]


# --------------------------- pure-JAX reference -----------------------------

def reference_forward(tokens, params):
    emb, w_ih, w_hh = params["embedding"], params["w_ih"], params["w_hh"]
    b_ih, b_hh = params["b_ih"], params["b_hh"]
    w_label, b_label = params["w_label"], params["b_label"]

    x = emb[tokens]                        # (B, S, E)
    x = jnp.transpose(x, (1, 0, 2))        # (S, B, E)
    B = tokens.shape[0]
    H = w_hh.shape[1]

    def step(carry, x_t):
        h, c = carry
        gates = x_t @ w_ih.T + b_ih + h @ w_hh.T + b_hh
        i, f, g, o = jnp.split(gates, 4, axis=-1)
        i, f, o = jax.nn.sigmoid(i), jax.nn.sigmoid(f), jax.nn.sigmoid(o)
        g = jnp.tanh(g)
        c = f * c + i * g
        h = o * jnp.tanh(c)
        return (h, c), h

    (h, _), _ = jax.lax.scan(step, (jnp.zeros((B, H)), jnp.zeros((B, H))), x)
    return h @ w_label.T + b_label


# --------------------------------- main -------------------------------------

if __name__ == "__main__":
    VOCAB, EMBED, HIDDEN, OUT = 50, 32, 128, 2
    BATCH, SEQ = 4, 8

    key = jax.random.PRNGKey(0)
    keys = jax.random.split(key, 8)
    k_hh = 1.0 / jnp.sqrt(HIDDEN)

    params = {
        "embedding": jax.random.normal(keys[0], (VOCAB, EMBED), jnp.float32),
        "w_ih":   jax.random.uniform(keys[1], (4 * HIDDEN, EMBED),  jnp.float32, -k_hh, k_hh),
        "w_hh":   jax.random.uniform(keys[2], (4 * HIDDEN, HIDDEN), jnp.float32, -k_hh, k_hh),
        "b_ih":   jax.random.uniform(keys[3], (4 * HIDDEN,),        jnp.float32, -k_hh, k_hh),
        "b_hh":   jax.random.uniform(keys[4], (4 * HIDDEN,),        jnp.float32, -k_hh, k_hh),
        "w_label": jax.random.uniform(keys[5], (OUT, HIDDEN),       jnp.float32, -k_hh, k_hh),
        "b_label": jax.random.uniform(keys[6], (OUT,),              jnp.float32, -k_hh, k_hh),
    }

    tokens = jax.random.randint(keys[7], (BATCH, SEQ), 0, VOCAB, dtype=jnp.int32)

    y = lstm_classification_forward(tokens, params)
    y = jax.block_until_ready(y)

    y_ref = jax.block_until_ready(reference_forward(tokens, params))
    assert y.shape == (BATCH, OUT)
    # Tolerance loosened (2e-3 -> 2e-2) for the bf16 MXU operands (weights/tables
    # in bf16, f32 accumulation and f32 activations/state). Any semantic error
    # (gate order, bias fold, last-step selection) is orders of magnitude larger.
    assert jnp.allclose(y, y_ref, atol=2e-2, rtol=2e-2), "mismatch vs JAX reference"

    print("KERNEL_OK")
</pallas_src>

<mosaic_0001>
module attributes {stable_mosaic.version = 11 : i64} {
  func.func @lstm_kernel(%arg0: i32, %arg1: memref<64x1xi32, #tpu.memory_space<vmem>>, %arg2: memref<56x512xbf16, #tpu.memory_space<vmem>>, %arg3: memref<128x512xbf16, #tpu.memory_space<vmem>>, %arg4: memref<128x128xf32, #tpu.memory_space<vmem>>, %arg5: memref<1x128xf32, #tpu.memory_space<vmem>>, %arg6: memref<8x128xf32, #tpu.memory_space<vmem>>, %arg7: memref<64x512xf32, #tpu.memory_space<vmem>>) attributes {dimension_semantics = [#tpu.dimension_semantics<arbitrary>], iteration_bounds = array<i64: 1>, scalar_prefetch = 0 : i64, scratch_operands = 1 : i64, tpu.core_type = #tpu.core_type<tc>, window_params = [{pipeline_mode = #tpu.pipeline_mode<synchronous>, transform_indices = @transform_0, window_bounds = array<i64: 64, 1>}, {pipeline_mode = #tpu.pipeline_mode<synchronous>, transform_indices = @transform_1, window_bounds = array<i64: 56, 512>}, {pipeline_mode = #tpu.pipeline_mode<synchronous>, transform_indices = @transform_2, window_bounds = array<i64: 128, 512>}, {pipeline_mode = #tpu.pipeline_mode<synchronous>, transform_indices = @transform_3, window_bounds = array<i64: 128, 128>}, {pipeline_mode = #tpu.pipeline_mode<synchronous>, transform_indices = @transform_4, window_bounds = array<i64: 1, 128>}, {pipeline_mode = #tpu.pipeline_mode<synchronous>, transform_indices = @transform_5, window_bounds = array<i64: 8, 128>}]} {
    %c0 = arith.constant 0 : index
    %c0_0 = arith.constant 0 : index
    %0 = vector.load %arg1[%c0, %c0_0] : memref<64x1xi32, #tpu.memory_space<vmem>>, vector<64x1xi32>
    %1 = tpu.iota {dimensions = array<i32: 1>} : vector<64x56xi32>
    %2 = vector.broadcast %0 : vector<64x1xi32> to vector<64x56xi32>
    %3 = arith.cmpi eq, %1, %2 : vector<64x56xi32>
    %cst = arith.constant 1.000000e+00 : f32
    %cst_1 = arith.constant 0.000000e+00 : f32
    %4 = vector.broadcast %cst : f32 to vector<64x56xf32>
    %5 = vector.broadcast %cst_1 : f32 to vector<64x56xf32>
    %6 = arith.select %3, %4, %5 : vector<64x56xi1>, vector<64x56xf32>
    %7 = arith.truncf %6 : vector<64x56xf32> to vector<64x56xbf16>
    %c0_2 = arith.constant 0 : index
    %c0_3 = arith.constant 0 : index
    %8 = vector.load %arg2[%c0_2, %c0_3] : memref<56x512xbf16, #tpu.memory_space<vmem>>, vector<56x512xbf16>
    %cst_4 = arith.constant dense<0.000000e+00> : vector<64x512xf32>
    %9 = tpu.matmul %7, %8, %cst_4 {dimension_numbers = #tpu.dot_dimension_numbers<[1], [0], [0], [1], [0, 0, 1, 1], [], []>} : vector<64x56xbf16>, vector<56x512xbf16>, vector<64x512xf32> -> vector<64x512xf32>
    %c0_5 = arith.constant 0 : index
    %c0_6 = arith.constant 0 : index
    %10 = vector.load %arg7[%c0_5, %c0_6] : memref<64x512xf32, #tpu.memory_space<vmem>>, vector<64x512xf32>
    tpu.vector_store %arg7[%c0_5, %c0_6], %9 {strides = array<i32>} : memref<64x512xf32, #tpu.memory_space<vmem>>, vector<64x512xf32>,
    %cst_7 = arith.constant 0.000000e+00 : f32
    %11 = vector.broadcast %cst_7 : f32 to vector<8x128xf32>
    %cst_8 = arith.constant 0.000000e+00 : f32
    %12 = vector.broadcast %cst_8 : f32 to vector<8x128xf32>
    %c0_9 = arith.constant 0 : index
    %c0_10 = arith.constant 0 : index
    %13 = vector.load %arg7[%c0_9, %c0_10] : memref<64x512xf32, #tpu.memory_space<vmem>>, vector<8x512xf32>
    %14 = arith.truncf %11 : vector<8x128xf32> to vector<8x128xbf16>
    %c0_11 = arith.constant 0 : index
    %c0_12 = arith.constant 0 : index
    %15 = vector.load %arg3[%c0_11, %c0_12] : memref<128x512xbf16, #tpu.memory_space<vmem>>, vector<128x512xbf16>
    %cst_13 = arith.constant dense<0.000000e+00> : vector<8x512xf32>
    %16 = tpu.matmul %14, %15, %cst_13 {dimension_numbers = #tpu.dot_dimension_numbers<[1], [0], [0], [1], [0, 0, 1, 1], [], []>} : vector<8x128xbf16>, vector<128x512xbf16>, vector<8x512xf32> -> vector<8x512xf32>
    %17 = arith.addf %13, %16 : vector<8x512xf32>
    %18 = vector.extract_strided_slice %17 {offsets = [0, 0], sizes = [8, 384], strides = [1, 1]} : vector<8x512xf32> to vector<8x384xf32>
    %19 = arith.negf %18 : vector<8x384xf32>
    %20 = math.exp %19 : vector<8x384xf32>
    %cst_14 = arith.constant 1.000000e+00 : f32
    %21 = vector.broadcast %cst_14 : f32 to vector<8x384xf32>
    %22 = arith.addf %21, %20 : vector<8x384xf32>
    %23 = arith.divf %21, %22 : vector<8x384xf32>
    %24 = vector.extract_strided_slice %17 {offsets = [0, 384], sizes = [8, 128], strides = [1, 1]} : vector<8x512xf32> to vector<8x128xf32>
    %25 = math.tanh %24 : vector<8x128xf32>
    %26 = vector.extract_strided_slice %23 {offsets = [0, 128], sizes = [8, 128], strides = [1, 1]} : vector<8x384xf32> to vector<8x128xf32>
    %27 = arith.mulf %26, %12 : vector<8x128xf32>
    %28 = vector.extract_strided_slice %23 {offsets = [0, 0], sizes = [8, 128], strides = [1, 1]} : vector<8x384xf32> to vector<8x128xf32>
    %29 = arith.mulf %28, %25 : vector<8x128xf32>
    %30 = arith.addf %27, %29 : vector<8x128xf32>
    %31 = vector.extract_strided_slice %23 {offsets = [0, 256], sizes = [8, 128], strides = [1, 1]} : vector<8x384xf32> to vector<8x128xf32>
    %32 = math.tanh %30 : vector<8x128xf32>
    %33 = arith.mulf %31, %32 : vector<8x128xf32>
    %c8 = arith.constant 8 : index
    %c0_15 = arith.constant 0 : index
    %34 = vector.load %arg7[%c8, %c0_15] : memref<64x512xf32, #tpu.memory_space<vmem>>, vector<8x512xf32>
    %35 = arith.truncf %33 : vector<8x128xf32> to vector<8x128xbf16>
    %c0_16 = arith.constant 0 : index
    %c0_17 = arith.constant 0 : index
    %36 = vector.load %arg3[%c0_16, %c0_17] : memref<128x512xbf16, #tpu.memory_space<vmem>>, vector<128x512xbf16>
    %cst_18 = arith.constant dense<0.000000e+00> : vector<8x512xf32>
    %37 = tpu.matmul %35, %36, %cst_18 {dimension_numbers = #tpu.dot_dimension_numbers<[1], [0], [0], [1], [0, 0, 1, 1], [], []>} : vector<8x128xbf16>, vector<128x512xbf16>, vector<8x512xf32> -> vector<8x512xf32>
    %38 = arith.addf %34, %37 : vector<8x512xf32>
    %39 = vector.extract_strided_slice %38 {offsets = [0, 0], sizes = [8, 384], strides = [1, 1]} : vector<8x512xf32> to vector<8x384xf32>
    %40 = arith.negf %39 : vector<8x384xf32>
    %41 = math.exp %40 : vector<8x384xf32>
    %cst_19 = arith.constant 1.000000e+00 : f32
    %42 = vector.broadcast %cst_19 : f32 to vector<8x384xf32>
    %43 = arith.addf %42, %41 : vector<8x384xf32>
    %44 = arith.divf %42, %43 : vector<8x384xf32>
    %45 = vector.extract_strided_slice %38 {offsets = [0, 384], sizes = [8, 128], strides = [1, 1]} : vector<8x512xf32> to vector<8x128xf32>
    %46 = math.tanh %45 : vector<8x128xf32>
    %47 = vector.extract_strided_slice %44 {offsets = [0, 128], sizes = [8, 128], strides = [1, 1]} : vector<8x384xf32> to vector<8x128xf32>
    %48 = arith.mulf %47, %30 : vector<8x128xf32>
    %49 = vector.extract_strided_slice %44 {offsets = [0, 0], sizes = [8, 128], strides = [1, 1]} : vector<8x384xf32> to vector<8x128xf32>
    %50 = arith.mulf %49, %46 : vector<8x128xf32>
    %51 = arith.addf %48, %50 : vector<8x128xf32>
    %52 = vector.extract_strided_slice %44 {offsets = [0, 256], sizes = [8, 128], strides = [1, 1]} : vector<8x384xf32> to vector<8x128xf32>
    %53 = math.tanh %51 : vector<8x128xf32>
    %54 = arith.mulf %52, %53 : vector<8x128xf32>
    %c16 = arith.constant 16 : index
    %c0_20 = arith.constant 0 : index
    %55 = vector.load %arg7[%c16, %c0_20] : memref<64x512xf32, #tpu.memory_space<vmem>>, vector<8x512xf32>
    %56 = arith.truncf %54 : vector<8x128xf32> to vector<8x128xbf16>
    %c0_21 = arith.constant 0 : index
    %c0_22 = arith.constant 0 : index
    %57 = vector.load %arg3[%c0_21, %c0_22] : memref<128x512xbf16, #tpu.memory_space<vmem>>, vector<128x512xbf16>
    %cst_23 = arith.constant dense<0.000000e+00> : vector<8x512xf32>
    %58 = tpu.matmul %56, %57, %cst_23 {dimension_numbers = #tpu.dot_dimension_numbers<[1], [0], [0], [1], [0, 0, 1, 1], [], []>} : vector<8x128xbf16>, vector<128x512xbf16>, vector<8x512xf32> -> vector<8x512xf32>
    %59 = arith.addf %55, %58 : vector<8x512xf32>
    %60 = vector.extract_strided_slice %59 {offsets = [0, 0], sizes = [8, 384], strides = [1, 1]} : vector<8x512xf32> to vector<8x384xf32>
    %61 = arith.negf %60 : vector<8x384xf32>
    %62 = math.exp %61 : vector<8x384xf32>
    %cst_24 = arith.constant 1.000000e+00 : f32
    %63 = vector.broadcast %cst_24 : f32 to vector<8x384xf32>
    %64 = arith.addf %63, %62 : vector<8x384xf32>
    %65 = arith.divf %63, %64 : vector<8x384xf32>
    %66 = vector.extract_strided_slice %59 {offsets = [0, 384], sizes = [8, 128], strides = [1, 1]} : vector<8x512xf32> to vector<8x128xf32>
    %67 = math.tanh %66 : vector<8x128xf32>
    %68 = vector.extract_strided_slice %65 {offsets = [0, 128], sizes = [8, 128], strides = [1, 1]} : vector<8x384xf32> to vector<8x128xf32>
    %69 = arith.mulf %68, %51 : vector<8x128xf32>
    %70 = vector.extract_strided_slice %65 {offsets = [0, 0], sizes = [8, 128], strides = [1, 1]} : vector<8x384xf32> to vector<8x128xf32>
    %71 = arith.mulf %70, %67 : vector<8x128xf32>
    %72 = arith.addf %69, %71 : vector<8x128xf32>
    %73 = vector.extract_strided_slice %65 {offsets = [0, 256], sizes = [8, 128], strides = [1, 1]} : vector<8x384xf32> to vector<8x128xf32>
    %74 = math.tanh %72 : vector<8x128xf32>
    %75 = arith.mulf %73, %74 : vector<8x128xf32>
    %c24 = arith.constant 24 : index
    %c0_25 = arith.constant 0 : index
    %76 = vector.load %arg7[%c24, %c0_25] : memref<64x512xf32, #tpu.memory_space<vmem>>, vector<8x512xf32>
    %77 = arith.truncf %75 : vector<8x128xf32> to vector<8x128xbf16>
    %c0_26 = arith.constant 0 : index
    %c0_27 = arith.constant 0 : index
    %78 = vector.load %arg3[%c0_26, %c0_27] : memref<128x512xbf16, #tpu.memory_space<vmem>>, vector<128x512xbf16>
    %cst_28 = arith.constant dense<0.000000e+00> : vector<8x512xf32>
    %79 = tpu.matmul %77, %78, %cst_28 {dimension_numbers = #tpu.dot_dimension_numbers<[1], [0], [0], [1], [0, 0, 1, 1], [], []>} : vector<8x128xbf16>, vector<128x512xbf16>, vector<8x512xf32> -> vector<8x512xf32>
    %80 = arith.addf %76, %79 : vector<8x512xf32>
    %81 = vector.extract_strided_slice %80 {offsets = [0, 0], sizes = [8, 384], strides = [1, 1]} : vector<8x512xf32> to vector<8x384xf32>
    %82 = arith.negf %81 : vector<8x384xf32>
    %83 = math.exp %82 : vector<8x384xf32>
    %cst_29 = arith.constant 1.000000e+00 : f32
    %84 = vector.broadcast %cst_29 : f32 to vector<8x384xf32>
    %85 = arith.addf %84, %83 : vector<8x384xf32>
    %86 = arith.divf %84, %85 : vector<8x384xf32>
    %87 = vector.extract_strided_slice %80 {offsets = [0, 384], sizes = [8, 128], strides = [1, 1]} : vector<8x512xf32> to vector<8x128xf32>
    %88 = math.tanh %87 : vector<8x128xf32>
    %89 = vector.extract_strided_slice %86 {offsets = [0, 128], sizes = [8, 128], strides = [1, 1]} : vector<8x384xf32> to vector<8x128xf32>
    %90 = arith.mulf %89, %72 : vector<8x128xf32>
    %91 = vector.extract_strided_slice %86 {offsets = [0, 0], sizes = [8, 128], strides = [1, 1]} : vector<8x384xf32> to vector<8x128xf32>
    %92 = arith.mulf %91, %88 : vector<8x128xf32>
    %93 = arith.addf %90, %92 : vector<8x128xf32>
    %94 = vector.extract_strided_slice %86 {offsets = [0, 256], sizes = [8, 128], strides = [1, 1]} : vector<8x384xf32> to vector<8x128xf32>
    %95 = math.tanh %93 : vector<8x128xf32>
    %96 = arith.mulf %94, %95 : vector<8x128xf32>
    %c32 = arith.constant 32 : index
    %c0_30 = arith.constant 0 : index
    %97 = vector.load %arg7[%c32, %c0_30] : memref<64x512xf32, #tpu.memory_space<vmem>>, vector<8x512xf32>
    %98 = arith.truncf %96 : vector<8x128xf32> to vector<8x128xbf16>
    %c0_31 = arith.constant 0 : index
    %c0_32 = arith.constant 0 : index
    %99 = vector.load %arg3[%c0_31, %c0_32] : memref<128x512xbf16, #tpu.memory_space<vmem>>, vector<128x512xbf16>
    %cst_33 = arith.constant dense<0.000000e+00> : vector<8x512xf32>
    %100 = tpu.matmul %98, %99, %cst_33 {dimension_numbers = #tpu.dot_dimension_numbers<[1], [0], [0], [1], [0, 0, 1, 1], [], []>} : vector<8x128xbf16>, vector<128x512xbf16>, vector<8x512xf32> -> vector<8x512xf32>
    %101 = arith.addf %97, %100 : vector<8x512xf32>
    %102 = vector.extract_strided_slice %101 {offsets = [0, 0], sizes = [8, 384], strides = [1, 1]} : vector<8x512xf32> to vector<8x384xf32>
    %103 = arith.negf %102 : vector<8x384xf32>
    %104 = math.exp %103 : vector<8x384xf32>
    %cst_34 = arith.constant 1.000000e+00 : f32
    %105 = vector.broadcast %cst_34 : f32 to vector<8x384xf32>
    %106 = arith.addf %105, %104 : vector<8x384xf32>
    %107 = arith.divf %105, %106 : vector<8x384xf32>
    %108 = vector.extract_strided_slice %101 {offsets = [0, 384], sizes = [8, 128], strides = [1, 1]} : vector<8x512xf32> to vector<8x128xf32>
    %109 = math.tanh %108 : vector<8x128xf32>
    %110 = vector.extract_strided_slice %107 {offsets = [0, 128], sizes = [8, 128], strides = [1, 1]} : vector<8x384xf32> to vector<8x128xf32>
    %111 = arith.mulf %110, %93 : vector<8x128xf32>
    %112 = vector.extract_strided_slice %107 {offsets = [0, 0], sizes = [8, 128], strides = [1, 1]} : vector<8x384xf32> to vector<8x128xf32>
    %113 = arith.mulf %112, %109 : vector<8x128xf32>
    %114 = arith.addf %111, %113 : vector<8x128xf32>
    %115 = vector.extract_strided_slice %107 {offsets = [0, 256], sizes = [8, 128], strides = [1, 1]} : vector<8x384xf32> to vector<8x128xf32>
    %116 = math.tanh %114 : vector<8x128xf32>
    %117 = arith.mulf %115, %116 : vector<8x128xf32>
    %c40 = arith.constant 40 : index
    %c0_35 = arith.constant 0 : index
    %118 = vector.load %arg7[%c40, %c0_35] : memref<64x512xf32, #tpu.memory_space<vmem>>, vector<8x512xf32>
    %119 = arith.truncf %117 : vector<8x128xf32> to vector<8x128xbf16>
    %c0_36 = arith.constant 0 : index
    %c0_37 = arith.constant 0 : index
    %120 = vector.load %arg3[%c0_36, %c0_37] : memref<128x512xbf16, #tpu.memory_space<vmem>>, vector<128x512xbf16>
    %cst_38 = arith.constant dense<0.000000e+00> : vector<8x512xf32>
    %121 = tpu.matmul %119, %120, %cst_38 {dimension_numbers = #tpu.dot_dimension_numbers<[1], [0], [0], [1], [0, 0, 1, 1], [], []>} : vector<8x128xbf16>, vector<128x512xbf16>, vector<8x512xf32> -> vector<8x512xf32>
    %122 = arith.addf %118, %121 : vector<8x512xf32>
    %123 = vector.extract_strided_slice %122 {offsets = [0, 0], sizes = [8, 384], strides = [1, 1]} : vector<8x512xf32> to vector<8x384xf32>
    %124 = arith.negf %123 : vector<8x384xf32>
    %125 = math.exp %124 : vector<8x384xf32>
    %cst_39 = arith.constant 1.000000e+00 : f32
    %126 = vector.broadcast %cst_39 : f32 to vector<8x384xf32>
    %127 = arith.addf %126, %125 : vector<8x384xf32>
    %128 = arith.divf %126, %127 : vector<8x384xf32>
    %129 = vector.extract_strided_slice %122 {offsets = [0, 384], sizes = [8, 128], strides = [1, 1]} : vector<8x512xf32> to vector<8x128xf32>
    %130 = math.tanh %129 : vector<8x128xf32>
    %131 = vector.extract_strided_slice %128 {offsets = [0, 128], sizes = [8, 128], strides = [1, 1]} : vector<8x384xf32> to vector<8x128xf32>
    %132 = arith.mulf %131, %114 : vector<8x128xf32>
    %133 = vector.extract_strided_slice %128 {offsets = [0, 0], sizes = [8, 128], strides = [1, 1]} : vector<8x384xf32> to vector<8x128xf32>
    %134 = arith.mulf %133, %130 : vector<8x128xf32>
    %135 = arith.addf %132, %134 : vector<8x128xf32>
    %136 = vector.extract_strided_slice %128 {offsets = [0, 256], sizes = [8, 128], strides = [1, 1]} : vector<8x384xf32> to vector<8x128xf32>
    %137 = math.tanh %135 : vector<8x128xf32>
    %138 = arith.mulf %136, %137 : vector<8x128xf32>
    %c48 = arith.constant 48 : index
    %c0_40 = arith.constant 0 : index
    %139 = vector.load %arg7[%c48, %c0_40] : memref<64x512xf32, #tpu.memory_space<vmem>>, vector<8x512xf32>
    %140 = arith.truncf %138 : vector<8x128xf32> to vector<8x128xbf16>
    %c0_41 = arith.constant 0 : index
    %c0_42 = arith.constant 0 : index
    %141 = vector.load %arg3[%c0_41, %c0_42] : memref<128x512xbf16, #tpu.memory_space<vmem>>, vector<128x512xbf16>
    %cst_43 = arith.constant dense<0.000000e+00> : vector<8x512xf32>
    %142 = tpu.matmul %140, %141, %cst_43 {dimension_numbers = #tpu.dot_dimension_numbers<[1], [0], [0], [1], [0, 0, 1, 1], [], []>} : vector<8x128xbf16>, vector<128x512xbf16>, vector<8x512xf32> -> vector<8x512xf32>
    %143 = arith.addf %139, %142 : vector<8x512xf32>
    %144 = vector.extract_strided_slice %143 {offsets = [0, 0], sizes = [8, 384], strides = [1, 1]} : vector<8x512xf32> to vector<8x384xf32>
    %145 = arith.negf %144 : vector<8x384xf32>
    %146 = math.exp %145 : vector<8x384xf32>
    %cst_44 = arith.constant 1.000000e+00 : f32
    %147 = vector.broadcast %cst_44 : f32 to vector<8x384xf32>
    %148 = arith.addf %147, %146 : vector<8x384xf32>
    %149 = arith.divf %147, %148 : vector<8x384xf32>
    %150 = vector.extract_strided_slice %143 {offsets = [0, 384], sizes = [8, 128], strides = [1, 1]} : vector<8x512xf32> to vector<8x128xf32>
    %151 = math.tanh %150 : vector<8x128xf32>
    %152 = vector.extract_strided_slice %149 {offsets = [0, 128], sizes = [8, 128], strides = [1, 1]} : vector<8x384xf32> to vector<8x128xf32>
    %153 = arith.mulf %152, %135 : vector<8x128xf32>
    %154 = vector.extract_strided_slice %149 {offsets = [0, 0], sizes = [8, 128], strides = [1, 1]} : vector<8x384xf32> to vector<8x128xf32>
    %155 = arith.mulf %154, %151 : vector<8x128xf32>
    %156 = arith.addf %153, %155 : vector<8x128xf32>
    %157 = vector.extract_strided_slice %149 {offsets = [0, 256], sizes = [8, 128], strides = [1, 1]} : vector<8x384xf32> to vector<8x128xf32>
    %158 = math.tanh %156 : vector<8x128xf32>
    %159 = arith.mulf %157, %158 : vector<8x128xf32>
    %c56 = arith.constant 56 : index
    %c0_45 = arith.constant 0 : index
    %160 = vector.load %arg7[%c56, %c0_45] : memref<64x512xf32, #tpu.memory_space<vmem>>, vector<8x512xf32>
    %161 = arith.truncf %159 : vector<8x128xf32> to vector<8x128xbf16>
    %c0_46 = arith.constant 0 : index
    %c0_47 = arith.constant 0 : index
    %162 = vector.load %arg3[%c0_46, %c0_47] : memref<128x512xbf16, #tpu.memory_space<vmem>>, vector<128x512xbf16>
    %cst_48 = arith.constant dense<0.000000e+00> : vector<8x512xf32>
    %163 = tpu.matmul %161, %162, %cst_48 {dimension_numbers = #tpu.dot_dimension_numbers<[1], [0], [0], [1], [0, 0, 1, 1], [], []>} : vector<8x128xbf16>, vector<128x512xbf16>, vector<8x512xf32> -> vector<8x512xf32>
    %164 = arith.addf %160, %163 : vector<8x512xf32>
    %165 = vector.extract_strided_slice %164 {offsets = [0, 0], sizes = [8, 384], strides = [1, 1]} : vector<8x512xf32> to vector<8x384xf32>
    %166 = arith.negf %165 : vector<8x384xf32>
    %167 = math.exp %166 : vector<8x384xf32>
    %cst_49 = arith.constant 1.000000e+00 : f32
    %168 = vector.broadcast %cst_49 : f32 to vector<8x384xf32>
    %169 = arith.addf %168, %167 : vector<8x384xf32>
    %170 = arith.divf %168, %169 : vector<8x384xf32>
    %171 = vector.extract_strided_slice %164 {offsets = [0, 384], sizes = [8, 128], strides = [1, 1]} : vector<8x512xf32> to vector<8x128xf32>
    %172 = math.tanh %171 : vector<8x128xf32>
    %173 = vector.extract_strided_slice %170 {offsets = [0, 128], sizes = [8, 128], strides = [1, 1]} : vector<8x384xf32> to vector<8x128xf32>
    %174 = arith.mulf %173, %156 : vector<8x128xf32>
    %175 = vector.extract_strided_slice %170 {offsets = [0, 0], sizes = [8, 128], strides = [1, 1]} : vector<8x384xf32> to vector<8x128xf32>
    %176 = arith.mulf %175, %172 : vector<8x128xf32>
    %177 = arith.addf %174, %176 : vector<8x128xf32>
    %178 = vector.extract_strided_slice %170 {offsets = [0, 256], sizes = [8, 128], strides = [1, 1]} : vector<8x384xf32> to vector<8x128xf32>
    %179 = math.tanh %177 : vector<8x128xf32>
    %180 = arith.mulf %178, %179 : vector<8x128xf32>
    %c0_50 = arith.constant 0 : index
    %c0_51 = arith.constant 0 : index
    %181 = vector.load %arg4[%c0_50, %c0_51] : memref<128x128xf32, #tpu.memory_space<vmem>>, vector<128x128xf32>
    %cst_52 = arith.constant dense<0.000000e+00> : vector<8x128xf32>
    %182 = tpu.matmul %180, %181, %cst_52 {dimension_numbers = #tpu.dot_dimension_numbers<[1], [0], [0], [1], [0, 0, 1, 1], [], []>} : vector<8x128xf32>, vector<128x128xf32>, vector<8x128xf32> -> vector<8x128xf32>
    %c0_53 = arith.constant 0 : index
    %c0_54 = arith.constant 0 : index
    %183 = vector.load %arg5[%c0_53, %c0_54] : memref<1x128xf32, #tpu.memory_space<vmem>>, vector<1x128xf32>
    %184 = vector.broadcast %183 : vector<1x128xf32> to vector<8x128xf32>
    %185 = arith.addf %182, %184 : vector<8x128xf32>
    %c0_55 = arith.constant 0 : index
    %c0_56 = arith.constant 0 : index
    %186 = vector.load %arg6[%c0_55, %c0_56] : memref<8x128xf32, #tpu.memory_space<vmem>>, vector<8x128xf32>
    tpu.vector_store %arg6[%c0_55, %c0_56], %185 {strides = array<i32>} : memref<8x128xf32, #tpu.memory_space<vmem>>, vector<8x128xf32>,
    return
  }
  func.func @transform_0(%arg0: i32) -> (i32, i32) {
    %c0_i32 = arith.constant 0 : i32
    %c0_i32_0 = arith.constant 0 : i32
    %c0_i32_1 = arith.constant 0 : i32
    return %c0_i32, %c0_i32_0 : i32, i32
  }
  func.func @transform_1(%arg0: i32) -> (i32, i32) {
    %c0_i32 = arith.constant 0 : i32
    %c0_i32_0 = arith.constant 0 : i32
    %c0_i32_1 = arith.constant 0 : i32
    return %c0_i32, %c0_i32_0 : i32, i32
  }
  func.func @transform_2(%arg0: i32) -> (i32, i32) {
    %c0_i32 = arith.constant 0 : i32
    %c0_i32_0 = arith.constant 0 : i32
    %c0_i32_1 = arith.constant 0 : i32
    return %c0_i32, %c0_i32_0 : i32, i32
  }
  func.func @transform_3(%arg0: i32) -> (i32, i32) {
    %c0_i32 = arith.constant 0 : i32
    %c0_i32_0 = arith.constant 0 : i32
    %c0_i32_1 = arith.constant 0 : i32
    return %c0_i32, %c0_i32_0 : i32, i32
  }
  func.func @transform_4(%arg0: i32) -> (i32, i32) {
    %c0_i32 = arith.constant 0 : i32
    %c0_i32_0 = arith.constant 0 : i32
    %c0_i32_1 = arith.constant 0 : i32
    return %c0_i32, %c0_i32_0 : i32, i32
  }
  func.func @transform_5(%arg0: i32) -> (i32, i32) {
    %c0_i32 = arith.constant 0 : i32
    %c0_i32_0 = arith.constant 0 : i32
    %c0_i32_1 = arith.constant 0 : i32
    return %c0_i32, %c0_i32_0 : i32, i32
  }
}

</mosaic_0001>

<bundles_post_ra>
// kernel: tpu_custom_call.1
= control target key start
LH: loop header
LB: loop body
LE: loop exit
PB: predicated region body
PF: predicated region fallthrough
CT: control target
= control target key end

     0   :  { %10 = vsyncpa [#allocation4], 0  ;;  %s2711_s0 = inlined_call_operand.vmem [shape: s32[64,1], index: 0, kind: input, shape index: {}]   ;;  %s2712_s1 = inlined_call_operand.hbm [shape: bf16[56,512], index: 1, kind: input, shape index: {}]   ;;  %s2713_s2 = inlined_call_operand.hbm [shape: bf16[128,512], index: 2, kind: input, shape index: {}]   ;;  %s2714_s3 = inlined_call_operand.hbm [shape: f32[128,128], index: 3, kind: input, shape index: {}]   ;;  %s2715_s4 = inlined_call_operand.vmem [shape: f32[1,128], index: 4, kind: input, shape index: {}]   ;;  %s2716_s5 = inlined_call_operand.hbm [shape: f32[8,128], index: 5, kind: output, shape index: {}]  }
   0x1   :  { %11 = vsyncpa [#allocation7], 0 }
   0x2   :  { %12 = vsyncpa [#allocation5], 0  ;;  %s32_s20 = sshll.u32 %s2713_s2, 4  ;;  %s2131_s21 = smov [#allocation6]   ;;  %s33_s20 = int_to_ptr.hbm [resolvable:$true] %s32_s20 }
   0x3   :  { %s34_s22 = sshll.u32 %s2131_s21, 4  ;;  %s19_s25 = sshll.u32 %s2712_s1, 4  ;;  %s35_s22 = int_to_ptr.vmem [resolvable:$true] %s34_s22  ;;  %s20_s25 = int_to_ptr.hbm [resolvable:$true] %s19_s25 }
   0x4   :  { %s2132_s26 = smov 256   ;;  %s2133_s27 = smov 16  }
   0x5   :  { %40 = dma.hbm_to_vmem [thread:$0]  %s33_s20, 4096, %s35_s22, [#allocation7], %s2132_s26, %s2132_s26, %s2133_s27  }
   0x6   :  { %s2134_s28 = smov [#allocation3]   ;;  %s45_s7 = sshll.u32 %s2714_s3, 4  ;;  %s46_s7 = int_to_ptr.hbm [resolvable:$true] %s45_s7 }
   0x7   :  { %s21_s29 = sshll.u32 %s2134_s28, 4  ;;  %s2135_s2 = smov [#allocation8]   ;;  %s22_s29 = int_to_ptr.vmem [resolvable:$true] %s21_s29 }
   0x8   :  { %27 = dma.hbm_to_vmem [thread:$0]  %s20_s25, 1792, %s22_s29, [#allocation4], %s2132_s26, %s2132_s26, %s2133_s27  }
   0x9   :  { %s47_s8 = sshll.u32 %s2135_s2, 4  ;;  %s2136_s9 = smov 128   ;;  %s48_s8 = int_to_ptr.vmem [resolvable:$true] %s47_s8 }
   0xa   :  { %s2137_s10 = smov 8  }
   0xb   :  { %53 = dma.hbm_to_vmem [thread:$0]  %s46_s7, 2048, %s48_s8, [#allocation7], %s2136_s9, %s2136_s9, %s2137_s10  }
   0xc   :  { %2125 = dma.done.wait [#allocation4], 1792  }
   0xd   :  { %2126 = vsyncadd [#allocation4], 4294965504 }
   0xe   :  { %2127 = dma.done.wait [#allocation7], 6144  }
   0xf   :  { %2128 = vsyncadd [#allocation7], 4294961152  ;;  %v2138_v0 = vmov 0   ;;  %v75_v1 = vld [vmem:[%s2711_s0 + $0x30] sm:$0xff]  ;;  %v69_v2 = vld [vmem:[%s2711_s0] sm:$0xff]  ;;  %vm220_vm0 = vcmask 1043456   ;;  %v77_v63 = vlaneseq }
  0x10   :  { %1898 = vset.pattern.permute.xlu1 %v2138_v0  ;;  %1897 = vset.pattern.permute.xlu0 %v2138_v0  ;;  %v71_v3 = vld [vmem:[%s2711_s0 + $0x10] sm:$0xff]  ;;  %v2192_v4 = vld [vmem:[#allocation3 + $0x60] sm:$0xff]  ;;  %v136_v6 = vld [vmem:[#allocation3 + $0x68] sm:$0xff]  ;;  %vm207_vm5 = vcmask 457728   ;;  %s2140_s26 = smov [#allocation9]   ;;  %s1612_s30 = sshll.u32 %s2716_s5, 4  ;;  %s1613_s30 = int_to_ptr.hbm [resolvable:$true] %s1612_s30 }
  0x11   :  { %1899 = vset.pattern.permute.xlu2 %v2138_v0  ;;  %98 = vperm.xlu0 %1897, %v75_v1   ;;  %v175_v5 = vunpack.c.l.b16 %v2192_v4  ;;  %v177_v7 = vunpack.c.l.b16 %v136_v6  ;;  %v178_v8 = vunpack.c.h.b16 %v136_v6  ;;  %v76_v10 = vld [vmem:[%s2711_s0 + $0x38] sm:$0xff]  ;;  %v70_v11 = vld [vmem:[%s2711_s0 + $0x8] sm:$0xff]  ;;  %v73_v18 = vld [vmem:[%s2711_s0 + $0x20] sm:$0xff]  ;;  %v176_v47 = vunpack.c.h.b16 %v2192_v4  ;;  %s1610_s27 = sshll.u32 %s2140_s26, 4  ;;  %s1611_s27 = int_to_ptr.vmem [resolvable:$true] %s1610_s27 }
  0x12   :  { %80 = vperm.xlu1 %1898, %v69_v2   ;;  %86 = vperm.xlu2 %1899, %v71_v3   ;;  %v72_v15 = vld [vmem:[%s2711_s0 + $0x18] sm:$0xff]  ;;  %v74_v19 = vld [vmem:[%s2711_s0 + $0x28] sm:$0xff]  ;;  %v1657_v20 = vld [vmem:[#allocation3 + $0x40] sm:$0xf] }
  0x13   :  { %v191_v9 = vpack.c.b16 %v175_v5, %v175_v5  ;;  %v193_v12 = vpack.c.b16 %v177_v7, %v177_v7  ;;  %v194_v13 = vpack.c.b16 %v178_v8, %v178_v8  ;;  %v1849_v21 = vld [vmem:[#allocation3 + $0x4c] sm:$0xf0]  ;;  %v1665_v22 = vld [vmem:[#allocation3 + $0x48] sm:$0xf]  ;;  %v1850_v24 = vld [vmem:[#allocation3 + $0x54] sm:$0xf0]  ;;  %v192_v48 = vpack.c.b16 %v176_v47, %v176_v47 }
  0x14   :  { %v1658_v23 = vor.u32 %v1849_v21, %v1657_v20  ;;  %v1848_v25 = vld [vmem:[#allocation3 + $0x4c] sm:$0xf]  ;;  %v1667_v26 = vld [vmem:[#allocation3 + $0x58] sm:$0xf0]  ;;  %v1666_v27 = vor.u32 %v1850_v24, %v1665_v22  ;;  %v1641_v29 = vld [vmem:[#allocation3 + $0x20] sm:$0xf] }
  0x15   :  { %v222_v14 = vsel %vm220_vm0, %v191_v9, 0  ;;  %v228_v16 = vsel %vm220_vm0, %v193_v12, 0  ;;  %v231_v17 = vsel %vm220_vm0, %v194_v13, 0  ;;  %v1670_v28 = vor.u32 %v1848_v25, %v1667_v26  ;;  %v1845_v30 = vld [vmem:[#allocation3 + $0x2c] sm:$0xf0] }
  0x16   :  { %237 = vmatpush.bf16.msra.mxu0 %v222_v14  ;;  %1883 = vmatpush.bf16.msra.mxu1 %v222_v14  ;;  %v1649_v31 = vld [vmem:[#allocation3 + $0x28] sm:$0xf]  ;;  %v1642_v32 = vor.u32 %v1845_v30, %v1641_v29  ;;  %v1846_v33 = vld [vmem:[#allocation3 + $0x34] sm:$0xf0]  ;;  %v1844_v34 = vld [vmem:[#allocation3 + $0x2c] sm:$0xf] }
  0x17   :  { %295 = vmatpush.bf16.msra.mxu2 %v228_v16  ;;  %324 = vmatpush.bf16.msra.mxu3 %v231_v17  ;;  %v1651_v35 = vld [vmem:[#allocation3 + $0x38] sm:$0xf0]  ;;  %v1650_v36 = vor.u32 %v1846_v33, %v1649_v31  ;;  %v1625_v38 = vld [vmem:[#allocation3] sm:$0xf]  ;;  %v1841_v39 = vld [vmem:[#allocation3 + $0xc] sm:$0xf0] }
  0x18   :  { %v1654_v37 = vor.u32 %v1844_v34, %v1651_v35  ;;  %v1633_v40 = vld [vmem:[#allocation3 + $0x8] sm:$0xf]  ;;  %v1626_v41 = vor.u32 %v1841_v39, %v1625_v38  ;;  %v1842_v42 = vld [vmem:[#allocation3 + $0x14] sm:$0xf0]  ;;  %v1840_v43 = vld [vmem:[#allocation3 + $0xc] sm:$0xf] }
  0x19   :  { %101 = vperm.xlu0 %1897, %v76_v10   ;;  %v1635_v44 = vld [vmem:[#allocation3 + $0x18] sm:$0xf0]  ;;  %v1634_v45 = vor.u32 %v1842_v42, %v1633_v40  ;;  %v225_v49 = vsel %vm220_vm0, %v192_v48, 0  ;;  %v1847_v50 = vld [vmem:[#allocation3 + $0x44] sm:$0xf]  ;;  %v2223_v12 = vand.u32 127, %v77_v63 }
  0x1a   :  { %83 = vperm.xlu1 %1898, %v70_v11   ;;  %89 = vperm.xlu2 %1899, %v72_v15   ;;  %v1638_v46 = vor.u32 %v1840_v43, %v1635_v44  ;;  %v1659_v51 = vld [vmem:[#allocation3 + $0x50] sm:$0xf0]  ;;  %v1843_v53 = vld [vmem:[#allocation3 + $0x24] sm:$0xf]  ;;  %v1801_v59 = vld [vmem:[#allocation6 + $0xe0] sm:$0xf] }
  0x1b   :  { %238 = vmatpush.bf16.msra.mxu0 %v1658_v23  ;;  %1884 = vmatpush.bf16.msra.mxu1 %v1658_v23  ;;  %v1662_v52 = vor.u32 %v1847_v50, %v1659_v51  ;;  %v1643_v54 = vld [vmem:[#allocation3 + $0x30] sm:$0xf0]  ;;  %v1839_v56 = vld [vmem:[#allocation3 + $0x4] sm:$0xf]  ;;  %v1881_v60 = vld [vmem:[#allocation6 + $0xec] sm:$0xf0] }
  0x1c   :  { %296 = vmatpush.bf16.msra.mxu2 %v1666_v27  ;;  %325 = vmatpush.bf16.msra.mxu3 %v1670_v28  ;;  %v1646_v55 = vor.u32 %v1843_v53, %v1643_v54  ;;  %v1627_v57 = vld [vmem:[#allocation3 + $0x10] sm:$0xf0]  ;;  %v2215_v61 = vor.u32 %v1881_v60, %v1801_v59  ;;  %v1785_v62 = vld [vmem:[#allocation6 + $0xc0] sm:$0xf]  ;;  %v1877_v1 = vld [vmem:[#allocation6 + $0xcc] sm:$0xf0] }
  0x1d   :  { %v1630_v58 = vor.u32 %v1839_v56, %v1627_v57  ;;  %v1809_v2 = vld [vmem:[#allocation6 + $0xe8] sm:$0xf]  ;;  %v1882_v3 = vld [vmem:[#allocation6 + $0xf4] sm:$0xf0]  ;;  %v2218_v6 = vor.u32 %v1877_v1, %v1785_v62  ;;  %v1769_v8 = vld [vmem:[#allocation6 + $0xa0] sm:$0xf] }
  0x1e   :  { %v2220_v7 = vor.u32 %v1882_v3, %v1809_v2  ;;  %v1873_v9 = vld [vmem:[#allocation6 + $0xac] sm:$0xf0]  ;;  %v1793_v10 = vld [vmem:[#allocation6 + $0xc8] sm:$0xf]  ;;  %v1878_v11 = vld [vmem:[#allocation6 + $0xd4] sm:$0xf0] }
  0x1f   :  { %239 = vmatpush.bf16.msra.mxu0 %v1642_v32  ;;  %1885 = vmatpush.bf16.msra.mxu1 %v1642_v32  ;;  %v2226_v13 = vor.u32 %v1873_v9, %v1769_v8  ;;  %v2228_v14 = vor.u32 %v1878_v11, %v1793_v10  ;;  %v1880_v15 = vld [vmem:[#allocation6 + $0xec] sm:$0xf]  ;;  %v1811_v16 = vld [vmem:[#allocation6 + $0xf8] sm:$0xf0]  ;;  %v1753_v17 = vld [vmem:[#allocation6 + $0x80] sm:$0xf] }
  0x20   :  { %297 = vmatpush.bf16.msra.mxu2 %v1650_v36  ;;  %326 = vmatpush.bf16.msra.mxu3 %v1654_v37  ;;  %v2139_v22 = vmov 0.0   ;;  %v1879_v26 = vld [vmem:[#allocation6 + $0xe4] sm:$0xf]  ;;  %v1803_v27 = vld [vmem:[#allocation6 + $0xf0] sm:$0xf0] }
  0x21   :  { %92 = vperm.xlu0 %1897, %v73_v18   ;;  %v1869_v18 = vld [vmem:[#allocation6 + $0x8c] sm:$0xf0]  ;;  %v2251_v33 = vor.u32 %v1879_v26, %v1803_v27  ;;  %v1875_v34 = vld [vmem:[#allocation6 + $0xc4] sm:$0xf]  ;;  %v1787_v35 = vld [vmem:[#allocation6 + $0xd0] sm:$0xf0] }
  0x22   :  { %95 = vperm.xlu1 %1898, %v74_v19   ;;  %v2230_v19 = vor.u32 %v1880_v15, %v1811_v16  ;;  %v2239_v21 = vor.u32 %v1869_v18, %v1753_v17  ;;  %v1737_v36 = vld [vmem:[#allocation6 + $0x60] sm:$0xf]  ;;  %v1865_v37 = vld [vmem:[#allocation6 + $0x6c] sm:$0xf0]  ;;  %v1871_v39 = vld [vmem:[#allocation6 + $0xa4] sm:$0xf] }
  0x23   :  { %240 = vmatpush.bf16.msra.mxu0 %v1626_v41  ;;  %1886 = vmatpush.bf16.msra.mxu1 %v1626_v41  ;;  %v2258_v38 = vor.u32 %v1865_v37, %v1737_v36  ;;  %v1721_v40 = vld [vmem:[#allocation6 + $0x40] sm:$0xf]  ;;  %v2265_v41 = vor.u32 %v1875_v34, %v1787_v35  ;;  %v1861_v42 = vld [vmem:[#allocation6 + $0x4c] sm:$0xf0]  ;;  %v1777_v43 = vld [vmem:[#allocation6 + $0xa8] sm:$0xf] }
  0x24   :  { %298 = vmatpush.bf16.msra.mxu2 %v1634_v45  ;;  %327 = vmatpush.bf16.msra.mxu3 %v1638_v46  ;;  %v1874_v44 = vld [vmem:[#allocation6 + $0xb4] sm:$0xf0]  ;;  %v1771_v46 = vld [vmem:[#allocation6 + $0xb0] sm:$0xf0]  ;;  %v2268_v47 = vor.u32 %v1861_v42, %v1721_v40  ;;  %v1795_v50 = vld [vmem:[#allocation6 + $0xd8] sm:$0xf0] }
  0x25   :  { %v2270_v48 = vor.u32 %v1874_v44, %v1777_v43  ;;  %v1857_v53 = vld [vmem:[#allocation6 + $0x2c] sm:$0xf0]  ;;  %v1872_v54 = vld [vmem:[#allocation6 + $0xac] sm:$0xf]  ;;  %v2279_v56 = vor.u32 %v1871_v39, %v1771_v46  ;;  %v1867_v57 = vld [vmem:[#allocation6 + $0x84] sm:$0xf] }
  0x26   :  { %v1761_v60 = vld [vmem:[#allocation6 + $0x88] sm:$0xf]  ;;  %v1689_v63 = vld [vmem:[#allocation6] sm:$0xf]  ;;  %v1853_v1 = vld [vmem:[#allocation6 + $0xc] sm:$0xf0] }
  0x27   :  { %266 = vmatpush.bf16.msrb.mxu1 %v225_v49  ;;  %577 = vmatpush.bf16.msrb.mxu0 %v2215_v61  ;;  %v1876_v49 = vld [vmem:[#allocation6 + $0xcc] sm:$0xf]  ;;  %v1870_v2 = vld [vmem:[#allocation6 + $0x94] sm:$0xf0]  ;;  %v2300_v11 = vor.u32 %v1853_v1, %v1689_v63  ;;  %v1745_v17 = vld [vmem:[#allocation6 + $0x68] sm:$0xf] }
  0x28   :  { %603 = vmatpush.bf16.msrb.mxu2 %v2220_v7  ;;  %616 = vmatpush.bf16.msrb.mxu3 %v2230_v19  ;;  %v2272_v51 = vor.u32 %v1876_v49, %v1795_v50  ;;  %v2287_v3 = vor.u32 %v1870_v2, %v1761_v60  ;;  %v1866_v18 = vld [vmem:[#allocation6 + $0x74] sm:$0xf0]  ;;  %v1739_v26 = vld [vmem:[#allocation6 + $0x70] sm:$0xf0]  ;;  %v1860_v34 = vld [vmem:[#allocation6 + $0x4c] sm:$0xf] }
  0x29   :  { %v1731_v35 = vld [vmem:[#allocation6 + $0x58] sm:$0xf0]  ;;  %v1859_v37 = vld [vmem:[#allocation6 + $0x44] sm:$0xf]  ;;  %v1723_v39 = vld [vmem:[#allocation6 + $0x50] sm:$0xf0] }
  0x2a   :  { %v2325_v36 = vor.u32 %v1860_v34, %v1731_v35  ;;  %v1713_v40 = vld [vmem:[#allocation6 + $0x28] sm:$0xf]  ;;  %v2329_v42 = vor.u32 %v1859_v37, %v1723_v39  ;;  %v1858_v43 = vld [vmem:[#allocation6 + $0x34] sm:$0xf0]  ;;  %v1856_v44 = vld [vmem:[#allocation6 + $0x2c] sm:$0xf] }
  0x2b   :  { %267 = vmatpush.bf16.msrb.mxu1 %v1662_v52  ;;  %578 = vmatpush.bf16.msrb.mxu0 %v2218_v6  ;;  %v1705_v52 = vld [vmem:[#allocation6 + $0x20] sm:$0xf]  ;;  %v2332_v50 = vor.u32 %v1858_v43, %v1713_v40 }
  0x2c   :  { %604 = vmatpush.bf16.msrb.mxu2 %v2228_v14  ;;  %v2282_v59 = vor.u32 %v1857_v53, %v1705_v52  ;;  %617 = vmatpush.bf16.msrb.mxu3 %v2272_v51  ;;  %v1697_v53 = vld [vmem:[#allocation6 + $0x8] sm:$0xf] }
  0x2f   :  { %268 = vmatpush.bf16.msrb.mxu1 %v1646_v55  ;;  %579 = vmatpush.bf16.msrb.mxu0 %v2226_v13  ;;  %v1779_v55 = vld [vmem:[#allocation6 + $0xb8] sm:$0xf0] }
  0x30   :  { %605 = vmatpush.bf16.msrb.mxu2 %v2270_v48  ;;  %v2285_v62 = vor.u32 %v1872_v54, %v1779_v55  ;;  %v1854_v54 = vld [vmem:[#allocation6 + $0x14] sm:$0xf0]  ;;  %v1852_v55 = vld [vmem:[#allocation6 + $0xc] sm:$0xf] }
  0x32   :  { %618 = vmatpush.bf16.msrb.mxu3 %v2285_v62 }
  0x33   :  { %269 = vmatpush.bf16.msrb.mxu1 %v1630_v58  ;;  %580 = vmatpush.bf16.msrb.mxu0 %v2239_v21  ;;  %v1755_v58 = vld [vmem:[#allocation6 + $0x90] sm:$0xf0] }
  0x34   :  { %v2297_v10 = vor.u32 %v1867_v57, %v1755_v58  ;;  %606 = vmatpush.bf16.msrb.mxu2 %v2287_v3  ;;  %v1699_v57 = vld [vmem:[#allocation6 + $0x18] sm:$0xf0]  ;;  %v2342_v58 = vor.u32 %v1854_v54, %v1697_v53 }
  0x35   :  { %v2347_v1 = vor.u32 %v1852_v55, %v1699_v57 }
  0x37   :  { %581 = vmatpush.bf16.msrb.mxu0 %v2258_v38 }
  0x3b   :  { %582 = vmatpush.bf16.msrb.mxu0 %v2268_v47 }
  0x3f   :  { %583 = vmatpush.bf16.msrb.mxu0 %v2282_v59 }
  0x43   :  { %584 = vmatpush.bf16.msrb.mxu0 %v2300_v11 }
  0x6c   :  { %v2233_v20 = vpop.permute.xlu2 %86 }
  0x6d   :  { %vm105_vm6 = vcmp.eq.s32.totalorder %v2223_v12, %v2233_v20  ;;  %v1864_v20 = vld [vmem:[#allocation6 + $0x6c] sm:$0xf] }
  0x6e   :  { %v113_v8 = vsel %vm105_vm6, 1.0, %v2139_v22 }
  0x74   :  { %v90_v45 = vpop.permute.xlu2 %89 }
  0x75   :  { %vm106_vm7 = vcmp.eq.s32.totalorder %v2223_v12, %v90_v45  ;;  %v1715_v45 = vld [vmem:[#allocation6 + $0x38] sm:$0xf0] }
  0x76   :  { %v114_v9 = vsel %vm106_vm7, 1.0, %v2139_v22  ;;  %v2335_v52 = vor.u32 %v1856_v44, %v1715_v45 }
  0x77   :  { %v120_v16 = vpack.c.bf16 %v114_v9, %v113_v8  ;;  %v1691_v8 = vld [vmem:[#allocation6 + $0x10] sm:$0xf0] }
  0x83   :  { %v99_v4 = vpop.permute.xlu0 %98 }
  0x84   :  { %v81_v5 = vpop.permute.xlu1 %80  ;;  %vm109_vm2 = vcmp.eq.s32.totalorder %v2223_v12, %v99_v4  ;;  %v1868_v4 = vld [vmem:[#allocation6 + $0x8c] sm:$0xf] }
  0x85   :  { %vm103_vm1 = vcmp.eq.s32.totalorder %v2223_v12, %v81_v5  ;;  %v117_v28 = vsel %vm109_vm2, 1.0, %v2139_v22  ;;  %v1763_v5 = vld [vmem:[#allocation6 + $0x98] sm:$0xf0] }
  0x86   :  { %v111_v23 = vsel %vm103_vm1, 1.0, %v2139_v22  ;;  %v2304_v15 = vor.u32 %v1868_v4, %v1763_v5  ;;  %v1707_v4 = vld [vmem:[#allocation6 + $0x30] sm:$0xf0]  ;;  %v1851_v5 = vld [vmem:[#allocation6 + $0x4] sm:$0xf] }
  0x87   :  { %v2362_v9 = vor.u32 %v1851_v5, %v1691_v8 }
  0x88   :  { %619 = vmatpush.bf16.msrb.mxu3 %v2304_v15 }
  0x8b   :  { %v102_v24 = vpop.permute.xlu0 %101 }
  0x8c   :  { %v84_v25 = vpop.permute.xlu1 %83  ;;  %vm110_vm3 = vcmp.eq.s32.totalorder %v2223_v12, %v102_v24  ;;  %v1747_v24 = vld [vmem:[#allocation6 + $0x78] sm:$0xf0] }
  0x8d   :  { %vm104_vm4 = vcmp.eq.s32.totalorder %v2223_v12, %v84_v25  ;;  %v118_v29 = vsel %vm110_vm3, 1.0, %v2139_v22  ;;  %v1863_v25 = vld [vmem:[#allocation6 + $0x64] sm:$0xf]  ;;  %v2317_v27 = vor.u32 %v1864_v20, %v1747_v24 }
  0x8e   :  { %v112_v30 = vsel %vm104_vm4, 1.0, %v2139_v22  ;;  %v2247_v31 = vpack.c.bf16 %v118_v29, %v117_v28  ;;  %v1729_v28 = vld [vmem:[#allocation6 + $0x48] sm:$0xf]  ;;  %v2319_v29 = vor.u32 %v1863_v25, %v1739_v26 }
  0x8f   :  { %v2249_v32 = vpack.c.bf16 %v112_v30, %v111_v23  ;;  %v2313_v23 = vor.u32 %v1866_v18, %v1745_v17  ;;  %v1862_v30 = vld [vmem:[#allocation6 + $0x54] sm:$0xf0]  ;;  %620 = vmatpush.bf16.msrb.mxu3 %v2317_v27 }
  0x90   :  { %1674 = vmatmul.msk.bf16.vlgmr.msra.gmra.mxu1 %vm207_vm5, %v2247_v31 }
  0x91   :  { %1671 = vmatmul.msk.bf16.vlgmr.msra.gmra.mxu0 %vm207_vm5, %v2249_v32  ;;  %1679 = vmatmul.msk.bf16.vlgmr.msra.gmra.mxu2 %vm207_vm5, %v2249_v32 }
  0x92   :  { %1683 = vmatmul.msk.bf16.vlgmr.msra.gmra.mxu3 %vm207_vm5, %v2249_v32  ;;  %590 = vmatpush.bf16.msra.mxu1 %v2251_v33 }
  0x93   :  { %701 = vmatpush.bf16.msra.mxu0 %v2215_v61  ;;  %607 = vmatpush.bf16.msrb.mxu2 %v2313_v23  ;;  %v93_v46 = vpop.permute.xlu0 %92 }
  0x94   :  { %v96_v49 = vpop.permute.xlu1 %95  ;;  %621 = vmatpush.bf16.msrb.mxu3 %v2325_v36  ;;  %vm107_vm8 = vcmp.eq.s32.totalorder %v2223_v12, %v93_v46 }
  0x95   :  { %vm108_vm9 = vcmp.eq.s32.totalorder %v2223_v12, %v96_v49  ;;  %v115_v60 = vsel %vm107_vm8, 1.0, %v2139_v22  ;;  %v1855_v12 = vld [vmem:[#allocation6 + $0x24] sm:$0xf] }
  0x96   :  { %591 = vmatpush.bf16.msra.mxu1 %v2265_v41  ;;  %v116_v63 = vsel %vm108_vm9, 1.0, %v2139_v22  ;;  %v2357_v22 = vor.u32 %v1855_v12, %v1707_v4 }
  0x97   :  { %702 = vmatpush.bf16.msra.mxu0 %v2218_v6  ;;  %v121_v2 = vpack.c.bf16 %v116_v63, %v115_v60 }
  0x98   :  { %622 = vmatpush.bf16.msrb.mxu3 %v2335_v52 }
  0x9a   :  { %592 = vmatpush.bf16.msra.mxu1 %v2279_v56 }
  0x9b   :  { %703 = vmatpush.bf16.msra.mxu0 %v2226_v13 }
  0x9c   :  { %623 = vmatpush.bf16.msrb.mxu3 %v2347_v1 }
  0x9e   :  { %593 = vmatpush.bf16.msra.mxu1 %v2297_v10 }
  0x9f   :  { %704 = vmatpush.bf16.msra.mxu0 %v2239_v21 }
  0xa0   :  { %1675 = vmatmul.msk.bf16.vlgmr.msrb.gmra.mxu1 %vm207_vm5, %v2249_v32  ;;  %v2323_v32 = vor.u32 %v1862_v30, %v1729_v28  ;;  %740 = vmatpush.bf16.msra.mxu3 %v2230_v19 }
  0xa1   :  { %1672 = vmatmul.msk.bf16.gmra.mxu0 %vm207_vm5, %v120_v16  ;;  %1680 = vmatmul.msk.bf16.gmra.mxu2 %vm207_vm5, %v120_v16 }
  0xa2   :  { %1684 = vmatmul.msk.bf16.gmra.mxu3 %vm207_vm5, %v120_v16  ;;  %594 = vmatpush.bf16.msra.mxu1 %v2319_v29 }
  0xa3   :  { %608 = vmatpush.bf16.msrb.mxu2 %v2323_v32  ;;  %705 = vmatpush.bf16.msra.mxu0 %v2258_v38 }
  0xa4   :  { %741 = vmatpush.bf16.msra.mxu3 %v2272_v51 }
  0xa6   :  { %595 = vmatpush.bf16.msra.mxu1 %v2329_v42 }
  0xa7   :  { %609 = vmatpush.bf16.msrb.mxu2 %v2332_v50  ;;  %706 = vmatpush.bf16.msra.mxu0 %v2268_v47 }
  0xa8   :  { %742 = vmatpush.bf16.msra.mxu3 %v2285_v62 }
  0xaa   :  { %596 = vmatpush.bf16.msra.mxu1 %v2357_v22 }
  0xab   :  { %610 = vmatpush.bf16.msrb.mxu2 %v2342_v58  ;;  %707 = vmatpush.bf16.msra.mxu0 %v2282_v59 }
  0xac   :  { %743 = vmatpush.bf16.msra.mxu3 %v2304_v15 }
  0xae   :  { %597 = vmatpush.bf16.msra.mxu1 %v2362_v9 }
  0xaf   :  { %727 = vmatpush.bf16.msra.mxu2 %v2220_v7  ;;  %708 = vmatpush.bf16.msra.mxu0 %v2300_v11 }
  0xb0   :  { %1676 = vmatmul.msk.bf16.gmra.mxu1 %vm207_vm5, %v120_v16  ;;  %744 = vmatpush.bf16.msra.mxu3 %v2317_v27 }
  0xb1   :  { %1673 = vmatmul.msk.bf16.gmra.mxu0 %vm207_vm5, %v121_v2  ;;  %1681 = vmatmul.msk.bf16.gmra.mxu2 %vm207_vm5, %v121_v2 }
  0xb2   :  { %1685 = vmatmul.msk.bf16.gmra.mxu3 %vm207_vm5, %v121_v2  ;;  %714 = vmatpush.bf16.msrb.mxu1 %v2251_v33 }
  0xb3   :  { %728 = vmatpush.bf16.msra.mxu2 %v2228_v14 }
  0xb4   :  { %745 = vmatpush.bf16.msra.mxu3 %v2325_v36 }
  0xb6   :  { %715 = vmatpush.bf16.msrb.mxu1 %v2265_v41 }
  0xb7   :  { %729 = vmatpush.bf16.msra.mxu2 %v2270_v48 }
  0xb8   :  { %746 = vmatpush.bf16.msra.mxu3 %v2335_v52 }
  0xba   :  { %716 = vmatpush.bf16.msrb.mxu1 %v2279_v56 }
  0xbb   :  { %730 = vmatpush.bf16.msra.mxu2 %v2287_v3 }
  0xbc   :  { %747 = vmatpush.bf16.msra.mxu3 %v2347_v1 }
  0xbe   :  { %717 = vmatpush.bf16.msrb.mxu1 %v2297_v10 }
  0xbf   :  { %731 = vmatpush.bf16.msra.mxu2 %v2313_v23 }
  0xc0   :  { %1677 = vmatmul.msk.bf16.gmra.mxu1 %vm207_vm5, %v121_v2 }
  0xc1   :  { %585 = vmatmul.bf16.vlgmr.msrb.gmra.mxu0 %v2138_v0  ;;  %1682 = vmatmul.msk.bf16.gmra.mxu2 %vm207_vm5, %v2247_v31 }
  0xc2   :  { %1686 = vmatmul.msk.bf16.gmra.mxu3 %vm207_vm5, %v2247_v31  ;;  %825 = vmatpush.bf16.msrb.mxu0 %v2215_v61 }
  0xc3   :  { %732 = vmatpush.bf16.msra.mxu2 %v2323_v32  ;;  %718 = vmatpush.bf16.msrb.mxu1 %v2319_v29 }
  0xc6   :  { %826 = vmatpush.bf16.msrb.mxu0 %v2218_v6 }
  0xc7   :  { %733 = vmatpush.bf16.msra.mxu2 %v2332_v50  ;;  %719 = vmatpush.bf16.msrb.mxu1 %v2329_v42 }
  0xca   :  { %827 = vmatpush.bf16.msrb.mxu0 %v2226_v13 }
  0xcb   :  { %734 = vmatpush.bf16.msra.mxu2 %v2342_v58  ;;  %720 = vmatpush.bf16.msrb.mxu1 %v2357_v22 }
  0xce   :  { %828 = vmatpush.bf16.msrb.mxu0 %v2239_v21 }
  0xcf   :  { %721 = vmatpush.bf16.msrb.mxu1 %v2362_v9 }
  0xd0   :  { %1678 = vmatmul.msk.bf16.gmra.mxu1 %vm207_vm5, %v2247_v31 }
  0xd1   :  { %611 = vmatmul.bf16.vlgmr.msrb.gmra.mxu2 %v2138_v0 }
  0xd2   :  { %624 = vmatmul.bf16.vlgmr.msrb.gmra.mxu3 %v2138_v0  ;;  %851 = vmatpush.bf16.msrb.mxu2 %v2220_v7 }
  0xd3   :  { %864 = vmatpush.bf16.msrb.mxu3 %v2230_v19  ;;  %829 = vmatpush.bf16.msrb.mxu0 %v2258_v38 }
  0xd6   :  { %852 = vmatpush.bf16.msrb.mxu2 %v2228_v14 }
  0xd7   :  { %865 = vmatpush.bf16.msrb.mxu3 %v2272_v51  ;;  %830 = vmatpush.bf16.msrb.mxu0 %v2268_v47 }
  0xda   :  { %853 = vmatpush.bf16.msrb.mxu2 %v2270_v48 }
  0xdb   :  { %866 = vmatpush.bf16.msrb.mxu3 %v2285_v62  ;;  %831 = vmatpush.bf16.msrb.mxu0 %v2282_v59 }
  0xde   :  { %854 = vmatpush.bf16.msrb.mxu2 %v2287_v3 }
  0xdf   :  { %867 = vmatpush.bf16.msrb.mxu3 %v2304_v15  ;;  %832 = vmatpush.bf16.msrb.mxu0 %v2300_v11 }
  0xe0   :  { %598 = vmatmul.bf16.vlgmr.msra.gmra.mxu1 %v2138_v0 }
  0xe1   :  { %838 = vmatpush.bf16.msra.mxu1 %v2251_v33 }
  0xe2   :  { %855 = vmatpush.bf16.msrb.mxu2 %v2313_v23 }
  0xe3   :  { %868 = vmatpush.bf16.msrb.mxu3 %v2317_v27 }
  0xe5   :  { %839 = vmatpush.bf16.msra.mxu1 %v2265_v41 }
  0xe6   :  { %856 = vmatpush.bf16.msrb.mxu2 %v2323_v32 }
  0xe7   :  { %869 = vmatpush.bf16.msrb.mxu3 %v2325_v36 }
  0xe9   :  { %840 = vmatpush.bf16.msra.mxu1 %v2279_v56 }
  0xea   :  { %857 = vmatpush.bf16.msrb.mxu2 %v2332_v50 }
  0xeb   :  { %870 = vmatpush.bf16.msrb.mxu3 %v2335_v52 }
  0xed   :  { %841 = vmatpush.bf16.msra.mxu1 %v2297_v10 }
  0xee   :  { %858 = vmatpush.bf16.msrb.mxu2 %v2342_v58 }
  0xef   :  { %871 = vmatpush.bf16.msrb.mxu3 %v2347_v1 }
  0xf1   :  { %842 = vmatpush.bf16.msra.mxu1 %v2319_v29 }
  0xf5   :  { %843 = vmatpush.bf16.msra.mxu1 %v2329_v42 }
  0xf9   :  { %844 = vmatpush.bf16.msra.mxu1 %v2357_v22 }
  0xfd   :  { %845 = vmatpush.bf16.msra.mxu1 %v2362_v9 }
 0x10d   :  { %v2433_v31 = vpop.f32.mrf.mxu1 }
 0x10e   :  { %v242_v0 = vpop.f32.mrf.mxu0  ;;  %2717 = vst [vmem:[#allocation13_spill] sm:$0xff] %v2433_v31 }
 0x114   :  { %v300_v16 = vpop.f32.mrf.mxu2 }
 0x115   :  { %v329_v17 = vpop.f32.mrf.mxu3  ;;  %v2437_v20 = vpop.f32.mrf.mxu1 }
 0x116   :  { %v2435_v18 = vpop.f32.mrf.mxu0  ;;  %2718 = vst [vmem:[#allocation14_spill] sm:$0xff] %v2437_v20 }
 0x11c   :  { %v2439_v24 = vpop.f32.mrf.mxu2 }
 0x11d   :  { %v2441_v25 = vpop.f32.mrf.mxu3  ;;  %v271_v28 = vpop.f32.mrf.mxu1 }
 0x11e   :  { %v2443_v26 = vpop.f32.mrf.mxu0 }
 0x124   :  { %v2445_v30 = vpop.f32.mrf.mxu2 }
 0x125   :  { %v2447_v34 = vpop.f32.mrf.mxu3  ;;  %v2451_v37 = vpop.f32.mrf.mxu1 }
 0x126   :  { %v2449_v35 = vpop.f32.mrf.mxu0 }
 0x12c   :  { %v2453_v39 = vpop.f32.mrf.mxu2 }
 0x12d   :  { %2719 = vst [vmem:[#allocation15_spill] sm:$0xff] %v2453_v39  ;;  %v2455_v40 = vpop.f32.mrf.mxu3  ;;  %v2459_v44 = vpop.f32.mrf.mxu1 }
 0x12e   :  { %2720 = vst [vmem:[#allocation16_spill] sm:$0xff] %v2455_v40  ;;  %v2457_v43 = vpop.f32.mrf.mxu0 }
 0x12f   :  { %2721 = vst [vmem:[#allocation17_spill] sm:$0xff] %v2457_v43 }
 0x134   :  { %v2461_v45 = vpop.f32.mrf.mxu2 }
 0x135   :  { %2722 = vst [vmem:[#allocation18_spill] sm:$0xff] %v2461_v45  ;;  %v2463_v46 = vpop.f32.mrf.mxu3  ;;  %v2467_v53 = vpop.f32.mrf.mxu1 }
 0x136   :  { %2723 = vst [vmem:[#allocation19_spill] sm:$0xff] %v2463_v46  ;;  %v2465_v49 = vpop.f32.mrf.mxu0 }
 0x137   :  { %2724 = vst [vmem:[#allocation20_spill] sm:$0xff] %v2465_v49 }
 0x13c   :  { %v2469_v54 = vpop.f32.mrf.mxu2 }
 0x13d   :  { %2725 = vst [vmem:[#allocation21_spill] sm:$0xff] %v2469_v54  ;;  %v2471_v55 = vpop.f32.mrf.mxu3  ;;  %v2473_v57 = vpop.f32.mrf.mxu1 }
 0x13e   :  { %2726 = vst [vmem:[#allocation22_spill] sm:$0xff] %v2471_v55  ;;  %v586_v60 = vpop.f32.mrf.mxu0 }
 0x13f   :  { %2727 = vst [vmem:[#allocation23_spill] sm:$0xff] %v2473_v57  ;;  %v629_v63 = vadd.f32 %v586_v60, %v242_v0 }
 0x141   :  { %v1815_v2 = vmul.f32 -1.442695, %v629_v63 }
 0x143   :  { %1901 = vpow2.f32 %v1815_v2 }
 0x144   :  { %v2475_v12 = vpop.f32.mrf.mxu2 }
 0x145   :  { %2728 = vst [vmem:[#allocation24_spill] sm:$0xff] %v2475_v12  ;;  %v2477_v4 = vpop.f32.mrf.mxu3  ;;  %v2479_v5 = vpop.f32.mrf.mxu1 }
 0x146   :  { %2729 = vst [vmem:[#allocation25_spill] sm:$0xff] %v2477_v4  ;;  %v588_v8 = vpop.f32.mrf.mxu0 }
 0x147   :  { %2730 = vst [vmem:[#allocation26_spill] sm:$0xff] %v2479_v5 }
 0x149   :  { %v1902_v20 = vpop.eup %1901 }
 0x14a   :  { %v642_v31 = vadd.f32 1.0, %v1902_v20 }
 0x14c   :  { %1903 = vrcp.f32 %v642_v31  ;;  %v2481_v49 = vpop.f32.mrf.mxu2  ;;  %v656_v45 = vand.u32 2147483648, %v642_v31  ;;  %v654_v20 = vand.u32 2147483647, %v642_v31  ;;  %vm650_vm11 = vweird.f32 %v642_v31 }
 0x14d   :  { %2731 = vst [vmem:[#allocation27_spill] sm:$0xff] %v2481_v49  ;;  %v2483_v54 = vpop.f32.mrf.mxu3  ;;  %v2485_v55 = vpop.f32.mrf.mxu1 }
 0x14e   :  { %2732 = vst [vmem:[#allocation28_spill] sm:$0xff] %v2483_v54  ;;  %v657_v54 = vor.u32 1.1754944e-38, %v656_v45  ;;  %vm655_vm13 = vcmp.eq.f32.partialorder %v654_v20, 8.507059e+37 }
 0x14f   :  { %2733 = vst [vmem:[#allocation29_spill] sm:$0xff] %v2485_v55 }
 0x152   :  { %v1904_v46 = vpop.eup %1903 }
 0x153   :  { %v646_v0 = vmul.f32 %v1904_v46, %v642_v31  ;;  %vm651_vm10 = vweird.f32 %v1904_v46 }
 0x154   :  { %v612_v63 = vpop.f32.mrf.mxu2  ;;  %vm652_vm12 = vmor %vm650_vm11, %vm651_vm10 }
 0x155   :  { %v647_v60 = vsub.f32 1.0, %v646_v0  ;;  %v625_v2 = vpop.f32.mrf.mxu3  ;;  %v2487_v4 = vpop.f32.mrf.mxu1  ;;  %v631_v5 = vadd.f32 %v612_v63, %v300_v16 }
 0x156   :  { %v632_v12 = vadd.f32 %v625_v2, %v329_v17  ;;  %2734 = vst [vmem:[#allocation30_spill] sm:$0xff] %v2487_v4 }
 0x157   :  { %v648_v8 = vmul.f32 %v1904_v46, %v647_v60  ;;  %v1817_v49 = vmul.f32 -1.442695, %v631_v5 }
 0x158   :  { %1905 = vtanh.f32 %v632_v12 }
 0x159   :  { %v649_v57 = vadd.f32 %v1904_v46, %v648_v8  ;;  %1907 = vpow2.f32 %v1817_v49 }
 0x15b   :  { %v653_v55 = vsel %vm652_vm12, %v1904_v46, %v649_v57 }
 0x15c   :  { %v658_v43 = vsel %vm655_vm13, %v657_v54, %v653_v55  ;;  %v614_v0 = vpop.f32.mrf.mxu2 }
 0x15d   :  { %v627_v40 = vpop.f32.mrf.mxu3  ;;  %v599_v17 = vpop.f32.mrf.mxu1 }
 0x15e   :  { %v1906_v39 = vpop.eup %1905  ;;  %v630_v4 = vadd.f32 %v599_v17, %v271_v28 }
 0x15f   :  { %v692_v2 = vmul.f32 %v1906_v39, %v658_v43  ;;  %v1908_v60 = vpop.eup %1907 }
 0x160   :  { %v1816_v16 = vmul.f32 -1.442695, %v630_v4  ;;  %v644_v12 = vadd.f32 1.0, %v1908_v60 }
 0x162   :  { %1909 = vpow2.f32 %v1816_v16  ;;  %vm680_vm3 = vweird.f32 %v644_v12 }
 0x163   :  { %1911 = vrcp.f32 %v644_v12 }
 0x165   :  { %v601_v63 = vpop.f32.mrf.mxu1 }
 0x166   :  { %v686_v63 = vand.u32 2147483648, %v644_v12 }
 0x168   :  { %v1910_v8 = vpop.eup %1909 }
 0x169   :  { %v643_v31 = vadd.f32 1.0, %v1910_v8  ;;  %v1912_v45 = vpop.eup %1911  ;;  %v684_v8 = vand.u32 2147483647, %v644_v12 }
 0x16a   :  { %v676_v54 = vmul.f32 %v1912_v45, %v644_v12  ;;  %vm681_vm2 = vweird.f32 %v1912_v45 }
 0x16b   :  { %1913 = vrcp.f32 %v643_v31  ;;  %v671_v40 = vand.u32 2147483648, %v643_v31  ;;  %v669_v49 = vand.u32 2147483647, %v643_v31  ;;  %vm665_vm15 = vweird.f32 %v643_v31  ;;  %vm682_vm4 = vmor %vm680_vm3, %vm681_vm2 }
 0x16c   :  { %v677_v39 = vsub.f32 1.0, %v676_v54  ;;  %v687_v54 = vor.u32 1.1754944e-38, %v686_v63  ;;  %vm685_vm5 = vcmp.eq.f32.partialorder %v684_v8, 8.507059e+37 }
 0x16d   :  { %v672_v43 = vor.u32 1.1754944e-38, %v671_v40  ;;  %vm670_vm1 = vcmp.eq.f32.partialorder %v669_v49, 8.507059e+37 }
 0x16e   :  { %v678_v0 = vmul.f32 %v1912_v45, %v677_v39 }
 0x170   :  { %v679_v60 = vadd.f32 %v1912_v45, %v678_v0 }
 0x171   :  { %v1914_v46 = vpop.eup %1913 }
 0x172   :  { %v661_v57 = vmul.f32 %v1914_v46, %v643_v31  ;;  %vm666_vm14 = vweird.f32 %v1914_v46 }
 0x173   :  { %vm667_vm0 = vmor %vm665_vm15, %vm666_vm14 }
 0x174   :  { %v662_v55 = vsub.f32 1.0, %v661_v57  ;;  %v683_v57 = vsel %vm682_vm4, %v1912_v45, %v679_v60 }
 0x176   :  { %v663_v5 = vmul.f32 %v1914_v46, %v662_v55  ;;  %v688_v55 = vsel %vm685_vm5, %v687_v54, %v683_v57 }
 0x178   :  { %v664_v28 = vadd.f32 %v1914_v46, %v663_v5 }
 0x17a   :  { %v668_v4 = vsel %vm667_vm0, %v1914_v46, %v664_v28 }
 0x17b   :  { %v673_v20 = vsel %vm670_vm1, %v672_v43, %v668_v4 }
 0x17c   :  { %v691_v17 = vmul.f32 0.0, %v673_v20 }
 0x17e   :  { %v2489_v16 = vadd.f32 %v692_v2, %v691_v17 }
 0x180   :  { %1915 = vtanh.f32 %v2489_v16 }
 0x186   :  { %v1916_v31 = vpop.eup %1915 }
 0x187   :  { %v695_v46 = vmul.f32 %v1916_v31, %v688_v55 }
 0x189   :  { %v700_v40 = vpack.c.bf16 %v695_v46, %v695_v46 }
 0x18b   :  { %709 = vmatmul.bf16.vlgmr.msra.gmra.mxu0 %v700_v40  ;;  %722 = vmatmul.bf16.vlgmr.msrb.gmra.mxu1 %v700_v40 }
 0x18c   :  { %735 = vmatmul.bf16.vlgmr.msra.gmra.mxu2 %v700_v40  ;;  %748 = vmatmul.bf16.vlgmr.msra.gmra.mxu3 %v700_v40 }
 0x18d   :  { %949 = vmatpush.bf16.msra.mxu0 %v2215_v61  ;;  %962 = vmatpush.bf16.msrb.mxu1 %v2251_v33 }
 0x18e   :  { %975 = vmatpush.bf16.msra.mxu2 %v2220_v7  ;;  %988 = vmatpush.bf16.msra.mxu3 %v2230_v19 }
 0x191   :  { %950 = vmatpush.bf16.msra.mxu0 %v2218_v6  ;;  %963 = vmatpush.bf16.msrb.mxu1 %v2265_v41 }
 0x192   :  { %976 = vmatpush.bf16.msra.mxu2 %v2228_v14  ;;  %989 = vmatpush.bf16.msra.mxu3 %v2272_v51 }
 0x195   :  { %951 = vmatpush.bf16.msra.mxu0 %v2226_v13  ;;  %964 = vmatpush.bf16.msrb.mxu1 %v2279_v56 }
 0x196   :  { %977 = vmatpush.bf16.msra.mxu2 %v2270_v48  ;;  %990 = vmatpush.bf16.msra.mxu3 %v2285_v62 }
 0x199   :  { %952 = vmatpush.bf16.msra.mxu0 %v2239_v21  ;;  %965 = vmatpush.bf16.msrb.mxu1 %v2297_v10 }
 0x19a   :  { %978 = vmatpush.bf16.msra.mxu2 %v2287_v3  ;;  %991 = vmatpush.bf16.msra.mxu3 %v2304_v15 }
 0x19d   :  { %953 = vmatpush.bf16.msra.mxu0 %v2258_v38  ;;  %966 = vmatpush.bf16.msrb.mxu1 %v2319_v29 }
 0x19e   :  { %979 = vmatpush.bf16.msra.mxu2 %v2313_v23  ;;  %992 = vmatpush.bf16.msra.mxu3 %v2317_v27 }
 0x1a1   :  { %954 = vmatpush.bf16.msra.mxu0 %v2268_v47  ;;  %967 = vmatpush.bf16.msrb.mxu1 %v2329_v42 }
 0x1a2   :  { %980 = vmatpush.bf16.msra.mxu2 %v2323_v32  ;;  %993 = vmatpush.bf16.msra.mxu3 %v2325_v36 }
 0x1a5   :  { %955 = vmatpush.bf16.msra.mxu0 %v2282_v59  ;;  %968 = vmatpush.bf16.msrb.mxu1 %v2357_v22 }
 0x1a6   :  { %981 = vmatpush.bf16.msra.mxu2 %v2332_v50  ;;  %994 = vmatpush.bf16.msra.mxu3 %v2335_v52 }
 0x1a9   :  { %956 = vmatpush.bf16.msra.mxu0 %v2300_v11  ;;  %969 = vmatpush.bf16.msrb.mxu1 %v2362_v9 }
 0x1aa   :  { %982 = vmatpush.bf16.msra.mxu2 %v2342_v58  ;;  %995 = vmatpush.bf16.msra.mxu3 %v2347_v1 }
 0x208   :  { %v710_v2 = vpop.f32.mrf.mxu0  ;;  %v723_v12 = vpop.f32.mrf.mxu1 }
 0x209   :  { %v753_v45 = vadd.f32 %v710_v2, %v2435_v18  ;;  %v754_v5 = vadd.f32 %v723_v12, %v2451_v37 }
 0x20b   :  { %v1818_v49 = vmul.f32 -1.442695, %v753_v45  ;;  %v1819_v39 = vmul.f32 -1.442695, %v754_v5 }
 0x20d   :  { %1917 = vpow2.f32 %v1818_v49 }
 0x20e   :  { %1919 = vpow2.f32 %v1819_v39 }
 0x20f   :  { %v736_v28 = vpop.f32.mrf.mxu2  ;;  %v749_v43 = vpop.f32.mrf.mxu3 }
 0x210   :  { %v755_v4 = vadd.f32 %v736_v28, %v2439_v24  ;;  %v712_v20 = vpop.f32.mrf.mxu0  ;;  %v725_v0 = vpop.f32.mrf.mxu1  ;;  %v756_v46 = vadd.f32 %v749_v43, %v2441_v25 }
 0x212   :  { %v1820_v17 = vmul.f32 -1.442695, %v755_v4 }
 0x213   :  { %v1918_v60 = vpop.eup %1917 }
 0x214   :  { %v1920_v63 = vpop.eup %1919  ;;  %v766_v8 = vadd.f32 1.0, %v1918_v60  ;;  %1921 = vpow2.f32 %v1820_v17 }
 0x215   :  { %v767_v57 = vadd.f32 1.0, %v1920_v63 }
 0x216   :  { %1923 = vrcp.f32 %v766_v8  ;;  %v780_v5 = vand.u32 2147483648, %v766_v8  ;;  %v778_v28 = vand.u32 2147483647, %v766_v8  ;;  %vm774_vm8 = vweird.f32 %v766_v8 }
 0x217   :  { %1925 = vrcp.f32 %v767_v57  ;;  %v738_v18 = vpop.f32.mrf.mxu2  ;;  %v751_v37 = vpop.f32.mrf.mxu3  ;;  %v795_v49 = vand.u32 2147483648, %v767_v57  ;;  %v793_v20 = vand.u32 2147483647, %v767_v57  ;;  %vm789_vm9 = vweird.f32 %v767_v57 }
 0x218   :  { %v781_v43 = vor.u32 1.1754944e-38, %v780_v5  ;;  %vm779_vm12 = vcmp.eq.f32.partialorder %v778_v28, 8.507059e+37 }
 0x219   :  { %v796_v63 = vor.u32 1.1754944e-38, %v795_v49  ;;  %vm794_vm13 = vcmp.eq.f32.partialorder %v793_v20, 8.507059e+37 }
 0x21a   :  { %v1922_v54 = vpop.eup %1921 }
 0x21b   :  { %v768_v31 = vadd.f32 1.0, %v1922_v54 }
 0x21c   :  { %v1924_v55 = vpop.eup %1923 }
 0x21d   :  { %v1926_v40 = vpop.eup %1925  ;;  %v770_v2 = vmul.f32 %v1924_v55, %v766_v8  ;;  %1927 = vrcp.f32 %v768_v31  ;;  %vm775_vm6 = vweird.f32 %v1924_v55  ;;  %v810_v5 = vand.u32 2147483648, %v768_v31 }
 0x21e   :  { %v785_v24 = vmul.f32 %v1926_v40, %v767_v57  ;;  %1929 = vtanh.f32 %v756_v46  ;;  %vm790_vm7 = vweird.f32 %v1926_v40  ;;  %vm776_vm10 = vmor %vm774_vm8, %vm775_vm6  ;;  %vm804_vm15 = vweird.f32 %v768_v31 }
 0x21f   :  { %v771_v12 = vsub.f32 1.0, %v770_v2  ;;  %vm791_vm11 = vmor %vm789_vm9, %vm790_vm7  ;;  %v811_v28 = vor.u32 1.1754944e-38, %v810_v5 }
 0x220   :  { %v786_v45 = vsub.f32 1.0, %v785_v24 }
 0x221   :  { %v772_v39 = vmul.f32 %v1924_v55, %v771_v12 }
 0x222   :  { %v787_v4 = vmul.f32 %v1926_v40, %v786_v45 }
 0x223   :  { %v1928_v0 = vpop.eup %1927  ;;  %v773_v17 = vadd.f32 %v1924_v55, %v772_v39 }
 0x224   :  { %v800_v25 = vmul.f32 %v1928_v0, %v768_v31  ;;  %v788_v60 = vadd.f32 %v1926_v40, %v787_v4  ;;  %v1930_v37 = vpop.eup %1929  ;;  %vm805_vm14 = vweird.f32 %v1928_v0 }
 0x225   :  { %v777_v18 = vsel %vm776_vm10, %v1924_v55, %v773_v17  ;;  %v808_v55 = vand.u32 2147483647, %v768_v31  ;;  %vm806_vm0 = vmor %vm804_vm15, %vm805_vm14 }
 0x226   :  { %v801_v54 = vsub.f32 1.0, %v800_v25  ;;  %v782_v46 = vsel %vm779_vm12, %v781_v43, %v777_v18  ;;  %v792_v2 = vsel %vm791_vm11, %v1926_v40, %v788_v60 }
 0x227   :  { %v797_v24 = vsel %vm794_vm13, %v796_v63, %v792_v2  ;;  %v816_v12 = vmul.f32 %v1930_v37, %v782_v46  ;;  %vm809_vm1 = vcmp.eq.f32.partialorder %v808_v55, 8.507059e+37 }
 0x228   :  { %v815_v45 = vmul.f32 %v797_v24, %v2489_v16  ;;  %v802_v39 = vmul.f32 %v1928_v0, %v801_v54 }
 0x22a   :  { %v2529_v8 = vadd.f32 %v816_v12, %v815_v45  ;;  %v803_v57 = vadd.f32 %v1928_v0, %v802_v39 }
 0x22c   :  { %1931 = vtanh.f32 %v2529_v8  ;;  %v807_v49 = vsel %vm806_vm0, %v1928_v0, %v803_v57 }
 0x22d   :  { %v812_v4 = vsel %vm809_vm1, %v811_v28, %v807_v49 }
 0x232   :  { %v1932_v40 = vpop.eup %1931 }
 0x233   :  { %v819_v20 = vmul.f32 %v1932_v40, %v812_v4 }
 0x235   :  { %v824_v17 = vpack.c.bf16 %v819_v20, %v819_v20 }
 0x237   :  { %833 = vmatmul.bf16.vlgmr.msrb.gmra.mxu0 %v824_v17  ;;  %846 = vmatmul.bf16.vlgmr.msra.gmra.mxu1 %v824_v17 }
 0x238   :  { %859 = vmatmul.bf16.vlgmr.msrb.gmra.mxu2 %v824_v17  ;;  %872 = vmatmul.bf16.vlgmr.msrb.gmra.mxu3 %v824_v17 }
 0x239   :  { %1073 = vmatpush.bf16.msrb.mxu0 %v2215_v61  ;;  %1086 = vmatpush.bf16.msra.mxu1 %v2251_v33 }
 0x23a   :  { %1099 = vmatpush.bf16.msrb.mxu2 %v2220_v7  ;;  %1112 = vmatpush.bf16.msrb.mxu3 %v2230_v19 }
 0x23d   :  { %1074 = vmatpush.bf16.msrb.mxu0 %v2218_v6  ;;  %1087 = vmatpush.bf16.msra.mxu1 %v2265_v41 }
 0x23e   :  { %1100 = vmatpush.bf16.msrb.mxu2 %v2228_v14  ;;  %1113 = vmatpush.bf16.msrb.mxu3 %v2272_v51 }
 0x241   :  { %1075 = vmatpush.bf16.msrb.mxu0 %v2226_v13  ;;  %1088 = vmatpush.bf16.msra.mxu1 %v2279_v56 }
 0x242   :  { %1101 = vmatpush.bf16.msrb.mxu2 %v2270_v48  ;;  %1114 = vmatpush.bf16.msrb.mxu3 %v2285_v62 }
 0x245   :  { %1076 = vmatpush.bf16.msrb.mxu0 %v2239_v21  ;;  %1089 = vmatpush.bf16.msra.mxu1 %v2297_v10 }
 0x246   :  { %1102 = vmatpush.bf16.msrb.mxu2 %v2287_v3  ;;  %1115 = vmatpush.bf16.msrb.mxu3 %v2304_v15 }
 0x249   :  { %1077 = vmatpush.bf16.msrb.mxu0 %v2258_v38  ;;  %1090 = vmatpush.bf16.msra.mxu1 %v2319_v29 }
 0x24a   :  { %1103 = vmatpush.bf16.msrb.mxu2 %v2313_v23  ;;  %1116 = vmatpush.bf16.msrb.mxu3 %v2317_v27 }
 0x24d   :  { %1078 = vmatpush.bf16.msrb.mxu0 %v2268_v47  ;;  %1091 = vmatpush.bf16.msra.mxu1 %v2329_v42 }
 0x24e   :  { %1104 = vmatpush.bf16.msrb.mxu2 %v2323_v32  ;;  %1117 = vmatpush.bf16.msrb.mxu3 %v2325_v36 }
 0x251   :  { %1079 = vmatpush.bf16.msrb.mxu0 %v2282_v59  ;;  %1092 = vmatpush.bf16.msra.mxu1 %v2357_v22 }
 0x252   :  { %1105 = vmatpush.bf16.msrb.mxu2 %v2332_v50  ;;  %1118 = vmatpush.bf16.msrb.mxu3 %v2335_v52 }
 0x255   :  { %1080 = vmatpush.bf16.msrb.mxu0 %v2300_v11  ;;  %1093 = vmatpush.bf16.msra.mxu1 %v2362_v9 }
 0x256   :  { %1106 = vmatpush.bf16.msrb.mxu2 %v2342_v58  ;;  %1119 = vmatpush.bf16.msrb.mxu3 %v2347_v1 }
 0x2b4   :  { %v834_v16 = vpop.f32.mrf.mxu0  ;;  %v847_v31 = vpop.f32.mrf.mxu1 }
 0x2b5   :  { %v877_v0 = vadd.f32 %v834_v16, %v2443_v26  ;;  %v878_v25 = vadd.f32 %v847_v31, %v2459_v44 }
 0x2b7   :  { %v1821_v43 = vmul.f32 -1.442695, %v877_v0  ;;  %v1822_v60 = vmul.f32 -1.442695, %v878_v25 }
 0x2b9   :  { %1933 = vpow2.f32 %v1821_v43 }
 0x2ba   :  { %1935 = vpow2.f32 %v1822_v60 }
 0x2bb   :  { %v860_v63 = vpop.f32.mrf.mxu2  ;;  %v873_v18 = vpop.f32.mrf.mxu3 }
 0x2bc   :  { %v879_v37 = vadd.f32 %v860_v63, %v2445_v30  ;;  %v836_v54 = vpop.f32.mrf.mxu0  ;;  %v849_v46 = vpop.f32.mrf.mxu1  ;;  %v880_v49 = vadd.f32 %v873_v18, %v2447_v34 }
 0x2be   :  { %v1823_v2 = vmul.f32 -1.442695, %v879_v37 }
 0x2bf   :  { %v1934_v24 = vpop.eup %1933 }
 0x2c0   :  { %v1936_v12 = vpop.eup %1935  ;;  %v890_v45 = vadd.f32 1.0, %v1934_v24  ;;  %1937 = vpow2.f32 %v1823_v2 }
 0x2c1   :  { %v891_v39 = vadd.f32 1.0, %v1936_v12 }
 0x2c2   :  { %1939 = vrcp.f32 %v890_v45  ;;  %v904_v17 = vand.u32 2147483648, %v890_v45  ;;  %v902_v0 = vand.u32 2147483647, %v890_v45  ;;  %vm898_vm4 = vweird.f32 %v890_v45 }
 0x2c3   :  { %1941 = vrcp.f32 %v891_v39  ;;  %v862_v26 = vpop.f32.mrf.mxu2  ;;  %v875_v44 = vpop.f32.mrf.mxu3  ;;  %v919_v16 = vand.u32 2147483648, %v891_v39  ;;  %v917_v43 = vand.u32 2147483647, %v891_v39  ;;  %vm913_vm5 = vweird.f32 %v891_v39 }
 0x2c4   :  { %v905_v18 = vor.u32 1.1754944e-38, %v904_v17  ;;  %vm903_vm8 = vcmp.eq.f32.partialorder %v902_v0, 8.507059e+37 }
 0x2c5   :  { %v920_v54 = vor.u32 1.1754944e-38, %v919_v16  ;;  %vm918_vm9 = vcmp.eq.f32.partialorder %v917_v43, 8.507059e+37 }
 0x2c6   :  { %v1938_v57 = vpop.eup %1937 }
 0x2c7   :  { %v892_v5 = vadd.f32 1.0, %v1938_v57 }
 0x2c8   :  { %v1940_v55 = vpop.eup %1939 }
 0x2c9   :  { %v1942_v28 = vpop.eup %1941  ;;  %v894_v40 = vmul.f32 %v1940_v55, %v890_v45  ;;  %1943 = vrcp.f32 %v892_v5  ;;  %vm899_vm2 = vweird.f32 %v1940_v55  ;;  %vm928_vm11 = vweird.f32 %v892_v5 }
 0x2ca   :  { %v909_v30 = vmul.f32 %v1942_v28, %v891_v39  ;;  %1945 = vtanh.f32 %v880_v49  ;;  %vm914_vm3 = vweird.f32 %v1942_v28  ;;  %vm900_vm6 = vmor %vm898_vm4, %vm899_vm2 }
 0x2cb   :  { %v895_v4 = vsub.f32 1.0, %v894_v40  ;;  %vm915_vm7 = vmor %vm913_vm5, %vm914_vm3 }
 0x2cc   :  { %v910_v20 = vsub.f32 1.0, %v909_v30  ;;  %v934_v30 = vand.u32 2147483648, %v892_v5 }
 0x2cd   :  { %v896_v31 = vmul.f32 %v1940_v55, %v895_v4 }
 0x2ce   :  { %v911_v25 = vmul.f32 %v1942_v28, %v910_v20  ;;  %v935_v20 = vor.u32 1.1754944e-38, %v934_v30 }
 0x2cf   :  { %v1944_v60 = vpop.eup %1943  ;;  %v897_v63 = vadd.f32 %v1940_v55, %v896_v31 }
 0x2d0   :  { %v924_v34 = vmul.f32 %v1944_v60, %v892_v5  ;;  %v912_v37 = vadd.f32 %v1942_v28, %v911_v25  ;;  %v1946_v2 = vpop.eup %1945  ;;  %vm929_vm10 = vweird.f32 %v1944_v60 }
 0x2d1   :  { %v901_v46 = vsel %vm900_vm6, %v1940_v55, %v897_v63  ;;  %v932_v55 = vand.u32 2147483647, %v892_v5  ;;  %vm930_vm12 = vmor %vm928_vm11, %vm929_vm10 }
 0x2d2   :  { %v925_v24 = vsub.f32 1.0, %v924_v34  ;;  %v906_v12 = vsel %vm903_vm8, %v905_v18, %v901_v46  ;;  %v916_v26 = vsel %vm915_vm7, %v1942_v28, %v912_v37  ;;  %v2735_v18 = vld [vmem:[#allocation15_spill] sm:$0xff] }
 0x2d3   :  { %v921_v44 = vsel %vm918_vm9, %v920_v54, %v916_v26  ;;  %v940_v57 = vmul.f32 %v1946_v2, %v906_v12  ;;  %vm933_vm13 = vcmp.eq.f32.partialorder %v932_v55, 8.507059e+37 }
 0x2d4   :  { %v939_v49 = vmul.f32 %v921_v44, %v2529_v8  ;;  %v926_v40 = vmul.f32 %v1944_v60, %v925_v24 }
 0x2d6   :  { %v2569_v45 = vadd.f32 %v940_v57, %v939_v49  ;;  %v927_v39 = vadd.f32 %v1944_v60, %v926_v40 }
 0x2d8   :  { %1947 = vtanh.f32 %v2569_v45  ;;  %v931_v4 = vsel %vm930_vm12, %v1944_v60, %v927_v39  ;;  %v2736_v39 = vld [vmem:[#allocation16_spill] sm:$0xff] }
 0x2d9   :  { %v936_v17 = vsel %vm933_vm13, %v935_v20, %v931_v4 }
 0x2de   :  { %v1948_v28 = vpop.eup %1947 }
 0x2df   :  { %v943_v16 = vmul.f32 %v1948_v28, %v936_v17 }
 0x2e1   :  { %v948_v31 = vpack.c.bf16 %v943_v16, %v943_v16 }
 0x2e3   :  { %957 = vmatmul.bf16.vlgmr.msra.gmra.mxu0 %v948_v31  ;;  %970 = vmatmul.bf16.vlgmr.msrb.gmra.mxu1 %v948_v31 }
 0x2e4   :  { %983 = vmatmul.bf16.vlgmr.msra.gmra.mxu2 %v948_v31  ;;  %996 = vmatmul.bf16.vlgmr.msra.gmra.mxu3 %v948_v31 }
 0x2e5   :  { %1197 = vmatpush.bf16.msra.mxu0 %v2215_v61  ;;  %1210 = vmatpush.bf16.msrb.mxu1 %v2251_v33 }
 0x2e6   :  { %1223 = vmatpush.bf16.msra.mxu2 %v2220_v7  ;;  %1236 = vmatpush.bf16.msra.mxu3 %v2230_v19 }
 0x2e9   :  { %1198 = vmatpush.bf16.msra.mxu0 %v2218_v6  ;;  %1211 = vmatpush.bf16.msrb.mxu1 %v2265_v41 }
 0x2ea   :  { %1224 = vmatpush.bf16.msra.mxu2 %v2228_v14  ;;  %1237 = vmatpush.bf16.msra.mxu3 %v2272_v51 }
 0x2ed   :  { %1199 = vmatpush.bf16.msra.mxu0 %v2226_v13  ;;  %1212 = vmatpush.bf16.msrb.mxu1 %v2279_v56 }
 0x2ee   :  { %1225 = vmatpush.bf16.msra.mxu2 %v2270_v48  ;;  %1238 = vmatpush.bf16.msra.mxu3 %v2285_v62 }
 0x2f1   :  { %1200 = vmatpush.bf16.msra.mxu0 %v2239_v21  ;;  %1213 = vmatpush.bf16.msrb.mxu1 %v2297_v10 }
 0x2f2   :  { %1226 = vmatpush.bf16.msra.mxu2 %v2287_v3  ;;  %1239 = vmatpush.bf16.msra.mxu3 %v2304_v15 }
 0x2f5   :  { %1201 = vmatpush.bf16.msra.mxu0 %v2258_v38  ;;  %1214 = vmatpush.bf16.msrb.mxu1 %v2319_v29 }
 0x2f6   :  { %1227 = vmatpush.bf16.msra.mxu2 %v2313_v23  ;;  %1240 = vmatpush.bf16.msra.mxu3 %v2317_v27 }
 0x2f9   :  { %1202 = vmatpush.bf16.msra.mxu0 %v2268_v47  ;;  %1215 = vmatpush.bf16.msrb.mxu1 %v2329_v42 }
 0x2fa   :  { %1228 = vmatpush.bf16.msra.mxu2 %v2323_v32  ;;  %1241 = vmatpush.bf16.msra.mxu3 %v2325_v36 }
 0x2fd   :  { %1203 = vmatpush.bf16.msra.mxu0 %v2282_v59  ;;  %1216 = vmatpush.bf16.msrb.mxu1 %v2357_v22 }
 0x2fe   :  { %1229 = vmatpush.bf16.msra.mxu2 %v2332_v50  ;;  %1242 = vmatpush.bf16.msra.mxu3 %v2335_v52 }
 0x301   :  { %1204 = vmatpush.bf16.msra.mxu0 %v2300_v11  ;;  %1217 = vmatpush.bf16.msrb.mxu1 %v2362_v9 }
 0x302   :  { %1230 = vmatpush.bf16.msra.mxu2 %v2342_v58  ;;  %1243 = vmatpush.bf16.msra.mxu3 %v2347_v1 }
 0x360   :  { %v958_v8 = vpop.f32.mrf.mxu0  ;;  %v971_v5 = vpop.f32.mrf.mxu1 }
 0x361   :  { %v1001_v0 = vadd.f32 %v958_v8, %v2449_v35  ;;  %v1002_v25 = vadd.f32 %v971_v5, %v2467_v53 }
 0x363   :  { %v1824_v43 = vmul.f32 -1.442695, %v1001_v0  ;;  %v1825_v60 = vmul.f32 -1.442695, %v1002_v25 }
 0x365   :  { %1949 = vpow2.f32 %v1824_v43 }
 0x366   :  { %1951 = vpow2.f32 %v1825_v60 }
 0x367   :  { %v984_v63 = vpop.f32.mrf.mxu2  ;;  %v997_v34 = vpop.f32.mrf.mxu3 }
 0x368   :  { %v1003_v37 = vadd.f32 %v984_v63, %v2735_v18  ;;  %v960_v54 = vpop.f32.mrf.mxu0  ;;  %v973_v46 = vpop.f32.mrf.mxu1  ;;  %v1004_v30 = vadd.f32 %v997_v34, %v2736_v39 }
 0x36a   :  { %v1826_v2 = vmul.f32 -1.442695, %v1003_v37 }
 0x36b   :  { %v1950_v24 = vpop.eup %1949 }
 0x36c   :  { %v1952_v12 = vpop.eup %1951  ;;  %v1014_v26 = vadd.f32 1.0, %v1950_v24  ;;  %1953 = vpow2.f32 %v1826_v2 }
 0x36d   :  { %v1015_v44 = vadd.f32 1.0, %v1952_v12 }
 0x36e   :  { %1955 = vrcp.f32 %v1014_v26  ;;  %v1028_v16 = vand.u32 2147483648, %v1014_v26  ;;  %v1026_v5 = vand.u32 2147483647, %v1014_v26  ;;  %vm1022_vm0 = vweird.f32 %v1014_v26 }
 0x36f   :  { %1957 = vrcp.f32 %v1015_v44  ;;  %v986_v35 = vpop.f32.mrf.mxu2  ;;  %v999_v53 = vpop.f32.mrf.mxu3  ;;  %v1043_v31 = vand.u32 2147483648, %v1015_v44  ;;  %v1041_v25 = vand.u32 2147483647, %v1015_v44  ;;  %vm1037_vm1 = vweird.f32 %v1015_v44 }
 0x370   :  { %v1029_v34 = vor.u32 1.1754944e-38, %v1028_v16  ;;  %vm1027_vm4 = vcmp.eq.f32.partialorder %v1026_v5, 8.507059e+37  ;;  %v2738_v5 = vld [vmem:[#allocation23_spill] sm:$0xff] }
 0x371   :  { %v1044_v37 = vor.u32 1.1754944e-38, %v1043_v31  ;;  %vm1042_vm5 = vcmp.eq.f32.partialorder %v1041_v25, 8.507059e+37  ;;  %v2737_v31 = vld [vmem:[#allocation17_spill] sm:$0xff] }
 0x372   :  { %v1954_v57 = vpop.eup %1953 }
 0x373   :  { %v1016_v49 = vadd.f32 1.0, %v1954_v57 }
 0x374   :  { %v1956_v40 = vpop.eup %1955 }
 0x375   :  { %v1958_v55 = vpop.eup %1957  ;;  %v1018_v4 = vmul.f32 %v1956_v40, %v1014_v26  ;;  %1959 = vrcp.f32 %v1016_v49  ;;  %vm1023_vm14 = vweird.f32 %v1956_v40  ;;  %vm1052_vm7 = vweird.f32 %v1016_v49 }
 0x376   :  { %v1033_v20 = vmul.f32 %v1958_v55, %v1015_v44  ;;  %1961 = vtanh.f32 %v1004_v30  ;;  %vm1038_vm15 = vweird.f32 %v1958_v55  ;;  %vm1024_vm2 = vmor %vm1022_vm0, %vm1023_vm14  ;;  %v1058_v30 = vand.u32 2147483648, %v1016_v49 }
 0x377   :  { %v1019_v28 = vsub.f32 1.0, %v1018_v4  ;;  %vm1039_vm3 = vmor %vm1037_vm1, %vm1038_vm15 }
 0x378   :  { %v1034_v17 = vsub.f32 1.0, %v1033_v20  ;;  %v1059_v20 = vor.u32 1.1754944e-38, %v1058_v30 }
 0x379   :  { %v1020_v8 = vmul.f32 %v1956_v40, %v1019_v28 }
 0x37a   :  { %v1035_v0 = vmul.f32 %v1958_v55, %v1034_v17 }
 0x37b   :  { %v1960_v43 = vpop.eup %1959  ;;  %v1021_v60 = vadd.f32 %v1956_v40, %v1020_v8 }
 0x37c   :  { %v1048_v63 = vmul.f32 %v1960_v43, %v1016_v49  ;;  %v1036_v18 = vadd.f32 %v1958_v55, %v1035_v0  ;;  %v1962_v46 = vpop.eup %1961  ;;  %vm1053_vm6 = vweird.f32 %v1960_v43 }
 0x37d   :  { %v1025_v54 = vsel %vm1024_vm2, %v1956_v40, %v1021_v60  ;;  %v1056_v40 = vand.u32 2147483647, %v1016_v49  ;;  %vm1054_vm8 = vmor %vm1052_vm7, %vm1053_vm6 }
 0x37e   :  { %v1049_v2 = vsub.f32 1.0, %v1048_v63  ;;  %v1030_v24 = vsel %vm1027_vm4, %v1029_v34, %v1025_v54  ;;  %v1040_v12 = vsel %vm1039_vm3, %v1958_v55, %v1036_v18  ;;  %v2739_v34 = vld [vmem:[#allocation18_spill] sm:$0xff] }
 0x37f   :  { %v1045_v35 = vsel %vm1042_vm5, %v1044_v37, %v1040_v12  ;;  %v1064_v53 = vmul.f32 %v1962_v46, %v1030_v24  ;;  %vm1057_vm9 = vcmp.eq.f32.partialorder %v1056_v40, 8.507059e+37  ;;  %v2740_v40 = vld [vmem:[#allocation19_spill] sm:$0xff] }
 0x380   :  { %v1063_v57 = vmul.f32 %v1045_v35, %v2569_v45  ;;  %v1050_v39 = vmul.f32 %v1960_v43, %v1049_v2 }
 0x382   :  { %v2609_v26 = vadd.f32 %v1064_v53, %v1063_v57  ;;  %v1051_v44 = vadd.f32 %v1960_v43, %v1050_v39 }
 0x384   :  { %1963 = vtanh.f32 %v2609_v26  ;;  %v1055_v4 = vsel %vm1054_vm8, %v1960_v43, %v1051_v44 }
 0x385   :  { %v1060_v28 = vsel %vm1057_vm9, %v1059_v20, %v1055_v4 }
 0x38a   :  { %v1964_v55 = vpop.eup %1963 }
 0x38b   :  { %v1067_v17 = vmul.f32 %v1964_v55, %v1060_v28 }
 0x38d   :  { %v1072_v16 = vpack.c.bf16 %v1067_v17, %v1067_v17 }
 0x38f   :  { %1081 = vmatmul.bf16.vlgmr.msrb.gmra.mxu0 %v1072_v16  ;;  %1094 = vmatmul.bf16.vlgmr.msra.gmra.mxu1 %v1072_v16 }
 0x390   :  { %1107 = vmatmul.bf16.vlgmr.msrb.gmra.mxu2 %v1072_v16  ;;  %1120 = vmatmul.bf16.vlgmr.msrb.gmra.mxu3 %v1072_v16 }
 0x391   :  { %1321 = vmatpush.bf16.msrb.mxu0 %v2215_v61  ;;  %1334 = vmatpush.bf16.msra.mxu1 %v2251_v33 }
 0x392   :  { %1347 = vmatpush.bf16.msrb.mxu2 %v2220_v7  ;;  %1360 = vmatpush.bf16.msrb.mxu3 %v2230_v19 }
 0x395   :  { %1322 = vmatpush.bf16.msrb.mxu0 %v2218_v6  ;;  %1335 = vmatpush.bf16.msra.mxu1 %v2265_v41 }
 0x396   :  { %1348 = vmatpush.bf16.msrb.mxu2 %v2228_v14  ;;  %1361 = vmatpush.bf16.msrb.mxu3 %v2272_v51 }
 0x399   :  { %1323 = vmatpush.bf16.msrb.mxu0 %v2226_v13  ;;  %1336 = vmatpush.bf16.msra.mxu1 %v2279_v56 }
 0x39a   :  { %1349 = vmatpush.bf16.msrb.mxu2 %v2270_v48  ;;  %1362 = vmatpush.bf16.msrb.mxu3 %v2285_v62 }
 0x39d   :  { %1324 = vmatpush.bf16.msrb.mxu0 %v2239_v21  ;;  %1337 = vmatpush.bf16.msra.mxu1 %v2297_v10 }
 0x39e   :  { %1350 = vmatpush.bf16.msrb.mxu2 %v2287_v3  ;;  %1363 = vmatpush.bf16.msrb.mxu3 %v2304_v15 }
 0x3a1   :  { %1325 = vmatpush.bf16.msrb.mxu0 %v2258_v38  ;;  %1338 = vmatpush.bf16.msra.mxu1 %v2319_v29 }
 0x3a2   :  { %1351 = vmatpush.bf16.msrb.mxu2 %v2313_v23  ;;  %1364 = vmatpush.bf16.msrb.mxu3 %v2317_v27 }
 0x3a5   :  { %1326 = vmatpush.bf16.msrb.mxu0 %v2268_v47  ;;  %1339 = vmatpush.bf16.msra.mxu1 %v2329_v42 }
 0x3a6   :  { %1352 = vmatpush.bf16.msrb.mxu2 %v2323_v32  ;;  %1365 = vmatpush.bf16.msrb.mxu3 %v2325_v36 }
 0x3a9   :  { %1327 = vmatpush.bf16.msrb.mxu0 %v2282_v59  ;;  %1340 = vmatpush.bf16.msra.mxu1 %v2357_v22 }
 0x3aa   :  { %1353 = vmatpush.bf16.msrb.mxu2 %v2332_v50  ;;  %1366 = vmatpush.bf16.msrb.mxu3 %v2335_v52 }
 0x3ad   :  { %1328 = vmatpush.bf16.msrb.mxu0 %v2300_v11  ;;  %1341 = vmatpush.bf16.msra.mxu1 %v2362_v9 }
 0x3ae   :  { %1354 = vmatpush.bf16.msrb.mxu2 %v2342_v58  ;;  %1367 = vmatpush.bf16.msrb.mxu3 %v2347_v1 }
 0x40c   :  { %v1082_v45 = vpop.f32.mrf.mxu0  ;;  %v1095_v49 = vpop.f32.mrf.mxu1 }
 0x40d   :  { %v1125_v8 = vadd.f32 %v1082_v45, %v2737_v31  ;;  %v1126_v0 = vadd.f32 %v1095_v49, %v2738_v5 }
 0x40f   :  { %v1827_v25 = vmul.f32 -1.442695, %v1125_v8  ;;  %v1828_v43 = vmul.f32 -1.442695, %v1126_v0 }
 0x411   :  { %1965 = vpow2.f32 %v1827_v25 }
 0x412   :  { %1967 = vpow2.f32 %v1828_v43 }
 0x413   :  { %v1108_v60 = vpop.f32.mrf.mxu2  ;;  %v1121_v63 = vpop.f32.mrf.mxu3 }
 0x414   :  { %v1127_v18 = vadd.f32 %v1108_v60, %v2739_v34  ;;  %v1084_v37 = vpop.f32.mrf.mxu0  ;;  %v1097_v54 = vpop.f32.mrf.mxu1  ;;  %v1128_v4 = vadd.f32 %v1121_v63, %v2740_v40 }
 0x416   :  { %v1829_v46 = vmul.f32 -1.442695, %v1127_v18 }
 0x417   :  { %v1966_v2 = vpop.eup %1965 }
 0x418   :  { %v1968_v24 = vpop.eup %1967  ;;  %v1138_v12 = vadd.f32 1.0, %v1966_v2  ;;  %1969 = vpow2.f32 %v1829_v46 }
 0x419   :  { %v1139_v35 = vadd.f32 1.0, %v1968_v24 }
 0x41a   :  { %1971 = vrcp.f32 %v1138_v12  ;;  %v1152_v45 = vand.u32 2147483648, %v1138_v12  ;;  %v1150_v8 = vand.u32 2147483647, %v1138_v12  ;;  %vm1146_vm12 = vweird.f32 %v1138_v12 }
 0x41b   :  { %1973 = vrcp.f32 %v1139_v35  ;;  %v1110_v53 = vpop.f32.mrf.mxu2  ;;  %v1123_v57 = vpop.f32.mrf.mxu3  ;;  %v1167_v49 = vand.u32 2147483648, %v1139_v35  ;;  %v1165_v0 = vand.u32 2147483647, %v1139_v35  ;;  %vm1161_vm13 = vweird.f32 %v1139_v35 }
 0x41c   :  { %v1153_v63 = vor.u32 1.1754944e-38, %v1152_v45  ;;  %vm1151_vm0 = vcmp.eq.f32.partialorder %v1150_v8, 8.507059e+37 }
 0x41d   :  { %v1168_v18 = vor.u32 1.1754944e-38, %v1167_v49  ;;  %vm1166_vm1 = vcmp.eq.f32.partialorder %v1165_v0, 8.507059e+37 }
 0x41e   :  { %v1970_v39 = vpop.eup %1969 }
 0x41f   :  { %v1140_v44 = vadd.f32 1.0, %v1970_v39 }
 0x420   :  { %v1972_v30 = vpop.eup %1971 }
 0x421   :  { %v1974_v20 = vpop.eup %1973  ;;  %v1142_v55 = vmul.f32 %v1972_v30, %v1138_v12  ;;  %1975 = vrcp.f32 %v1140_v44  ;;  %vm1147_vm10 = vweird.f32 %v1972_v30  ;;  %vm1176_vm3 = vweird.f32 %v1140_v44 }
 0x422   :  { %v1157_v28 = vmul.f32 %v1974_v20, %v1139_v35  ;;  %1977 = vtanh.f32 %v1128_v4  ;;  %vm1162_vm11 = vweird.f32 %v1974_v20  ;;  %vm1148_vm14 = vmor %vm1146_vm12, %vm1147_vm10  ;;  %v1182_v4 = vand.u32 2147483648, %v1140_v44 }
 0x423   :  { %v1143_v17 = vsub.f32 1.0, %v1142_v55  ;;  %vm1163_vm15 = vmor %vm1161_vm13, %vm1162_vm11 }
 0x424   :  { %v1158_v16 = vsub.f32 1.0, %v1157_v28  ;;  %v1183_v28 = vor.u32 1.1754944e-38, %v1182_v4 }
 0x425   :  { %v1144_v31 = vmul.f32 %v1972_v30, %v1143_v17 }
 0x426   :  { %v1159_v5 = vmul.f32 %v1974_v20, %v1158_v16 }
 0x427   :  { %v1976_v25 = vpop.eup %1975  ;;  %v1145_v43 = vadd.f32 %v1972_v30, %v1144_v31 }
 0x428   :  { %v1172_v60 = vmul.f32 %v1976_v25, %v1140_v44  ;;  %v1160_v34 = vadd.f32 %v1974_v20, %v1159_v5  ;;  %v1978_v54 = vpop.eup %1977  ;;  %vm1177_vm2 = vweird.f32 %v1976_v25 }
 0x429   :  { %v1149_v37 = vsel %vm1148_vm14, %v1972_v30, %v1145_v43  ;;  %v1180_v30 = vand.u32 2147483647, %v1140_v44  ;;  %vm1178_vm4 = vmor %vm1176_vm3, %vm1177_vm2 }
 0x42a   :  { %v1173_v46 = vsub.f32 1.0, %v1172_v60  ;;  %v1154_v2 = vsel %vm1151_vm0, %v1153_v63, %v1149_v37  ;;  %v1164_v24 = vsel %vm1163_vm15, %v1974_v20, %v1160_v34 }
 0x42b   :  { %v1169_v53 = vsel %vm1166_vm1, %v1168_v18, %v1164_v24  ;;  %v1188_v57 = vmul.f32 %v1978_v54, %v1154_v2  ;;  %vm1181_vm5 = vcmp.eq.f32.partialorder %v1180_v30, 8.507059e+37 }
 0x42c   :  { %v1187_v39 = vmul.f32 %v1169_v53, %v2609_v26  ;;  %v1174_v40 = vmul.f32 %v1976_v25, %v1173_v46 }
 0x42e   :  { %v2649_v12 = vadd.f32 %v1188_v57, %v1187_v39  ;;  %v1175_v35 = vadd.f32 %v1976_v25, %v1174_v40 }
 0x430   :  { %1979 = vtanh.f32 %v2649_v12  ;;  %v1179_v55 = vsel %vm1178_vm4, %v1976_v25, %v1175_v35 }
 0x431   :  { %v1184_v17 = vsel %vm1181_vm5, %v1183_v28, %v1179_v55 }
 0x436   :  { %v1980_v20 = vpop.eup %1979 }
 0x437   :  { %v1191_v16 = vmul.f32 %v1980_v20, %v1184_v17 }
 0x439   :  { %v1196_v45 = vpack.c.bf16 %v1191_v16, %v1191_v16 }
 0x43b   :  { %1205 = vmatmul.bf16.vlgmr.msra.gmra.mxu0 %v1196_v45  ;;  %1218 = vmatmul.bf16.vlgmr.msrb.gmra.mxu1 %v1196_v45 }
 0x43c   :  { %1231 = vmatmul.bf16.vlgmr.msra.gmra.mxu2 %v1196_v45  ;;  %1244 = vmatmul.bf16.vlgmr.msra.gmra.mxu3 %v1196_v45 }
 0x43d   :  { %1445 = vmatpush.bf16.msra.mxu0 %v2215_v61  ;;  %1458 = vmatpush.bf16.msrb.mxu1 %v2251_v33 }
 0x43e   :  { %1471 = vmatpush.bf16.msra.mxu2 %v2220_v7  ;;  %1484 = vmatpush.bf16.msra.mxu3 %v2230_v19  ;;  %v2741_v7 = vld [vmem:[#allocation20_spill] sm:$0xff] }
 0x441   :  { %1446 = vmatpush.bf16.msra.mxu0 %v2218_v6  ;;  %1459 = vmatpush.bf16.msrb.mxu1 %v2265_v41 }
 0x442   :  { %1472 = vmatpush.bf16.msra.mxu2 %v2228_v14  ;;  %1485 = vmatpush.bf16.msra.mxu3 %v2272_v51  ;;  %v2742_v14 = vld [vmem:[#allocation26_spill] sm:$0xff] }
 0x445   :  { %1447 = vmatpush.bf16.msra.mxu0 %v2226_v13  ;;  %1460 = vmatpush.bf16.msrb.mxu1 %v2279_v56 }
 0x446   :  { %1473 = vmatpush.bf16.msra.mxu2 %v2270_v48  ;;  %1486 = vmatpush.bf16.msra.mxu3 %v2285_v62 }
 0x449   :  { %1448 = vmatpush.bf16.msra.mxu0 %v2239_v21  ;;  %1461 = vmatpush.bf16.msrb.mxu1 %v2297_v10 }
 0x44a   :  { %1474 = vmatpush.bf16.msra.mxu2 %v2287_v3  ;;  %1487 = vmatpush.bf16.msra.mxu3 %v2304_v15 }
 0x44d   :  { %1449 = vmatpush.bf16.msra.mxu0 %v2258_v38  ;;  %1462 = vmatpush.bf16.msrb.mxu1 %v2319_v29 }
 0x44e   :  { %1475 = vmatpush.bf16.msra.mxu2 %v2313_v23  ;;  %1488 = vmatpush.bf16.msra.mxu3 %v2317_v27 }
 0x451   :  { %1450 = vmatpush.bf16.msra.mxu0 %v2268_v47  ;;  %1463 = vmatpush.bf16.msrb.mxu1 %v2329_v42  ;;  %v2743_v47 = vld [vmem:[#allocation21_spill] sm:$0xff] }
 0x452   :  { %1476 = vmatpush.bf16.msra.mxu2 %v2323_v32  ;;  %1489 = vmatpush.bf16.msra.mxu3 %v2325_v36  ;;  %v2744_v36 = vld [vmem:[#allocation22_spill] sm:$0xff] }
 0x455   :  { %1451 = vmatpush.bf16.msra.mxu0 %v2282_v59  ;;  %1464 = vmatpush.bf16.msrb.mxu1 %v2357_v22 }
 0x456   :  { %1477 = vmatpush.bf16.msra.mxu2 %v2332_v50  ;;  %1490 = vmatpush.bf16.msra.mxu3 %v2335_v52 }
 0x459   :  { %1452 = vmatpush.bf16.msra.mxu0 %v2300_v11  ;;  %1465 = vmatpush.bf16.msrb.mxu1 %v2362_v9 }
 0x45a   :  { %1478 = vmatpush.bf16.msra.mxu2 %v2342_v58  ;;  %1491 = vmatpush.bf16.msra.mxu3 %v2347_v1 }
 0x4b8   :  { %v1206_v61 = vpop.f32.mrf.mxu0  ;;  %v1219_v6 = vpop.f32.mrf.mxu1 }
 0x4b9   :  { %v1249_v13 = vadd.f32 %v1206_v61, %v2741_v7  ;;  %v1250_v19 = vadd.f32 %v1219_v6, %v2742_v14  ;;  %v2745_v61 = vld [vmem:[#allocation13_spill] sm:$0xff] }
 0x4ba   :  { %v2746_v7 = vld [vmem:[#allocation29_spill] sm:$0xff] }
 0x4bb   :  { %v1830_v21 = vmul.f32 -1.442695, %v1249_v13  ;;  %v1831_v33 = vmul.f32 -1.442695, %v1250_v19 }
 0x4bd   :  { %1981 = vpow2.f32 %v1830_v21 }
 0x4be   :  { %1983 = vpow2.f32 %v1831_v33 }
 0x4bf   :  { %v1232_v38 = vpop.f32.mrf.mxu2  ;;  %v1245_v41 = vpop.f32.mrf.mxu3 }
 0x4c0   :  { %v1251_v48 = vadd.f32 %v1232_v38, %v2743_v47  ;;  %v1208_v51 = vpop.f32.mrf.mxu0  ;;  %v1221_v56 = vpop.f32.mrf.mxu1  ;;  %v1252_v42 = vadd.f32 %v1245_v41, %v2744_v36  ;;  %v2747_v38 = vld [vmem:[#allocation24_spill] sm:$0xff] }
 0x4c2   :  { %v1832_v59 = vmul.f32 -1.442695, %v1251_v48 }
 0x4c3   :  { %v1982_v62 = vpop.eup %1981 }
 0x4c4   :  { %v1984_v3 = vpop.eup %1983  ;;  %v1262_v10 = vadd.f32 1.0, %v1982_v62  ;;  %1985 = vpow2.f32 %v1832_v59 }
 0x4c5   :  { %v1263_v11 = vadd.f32 1.0, %v1984_v3 }
 0x4c6   :  { %1987 = vrcp.f32 %v1262_v10  ;;  %v1276_v9 = vand.u32 2147483648, %v1262_v10  ;;  %v1274_v49 = vand.u32 2147483647, %v1262_v10  ;;  %vm1270_vm8 = vweird.f32 %v1262_v10 }
 0x4c7   :  { %1989 = vrcp.f32 %v1263_v11  ;;  %v1234_v15 = vpop.f32.mrf.mxu2  ;;  %v1247_v23 = vpop.f32.mrf.mxu3  ;;  %v1291_v26 = vand.u32 2147483648, %v1263_v11  ;;  %v1289_v8 = vand.u32 2147483647, %v1263_v11  ;;  %vm1285_vm9 = vweird.f32 %v1263_v11 }
 0x4c8   :  { %v1277_v43 = vor.u32 1.1754944e-38, %v1276_v9  ;;  %vm1275_vm12 = vcmp.eq.f32.partialorder %v1274_v49, 8.507059e+37 }
 0x4c9   :  { %v1292_v63 = vor.u32 1.1754944e-38, %v1291_v26  ;;  %vm1290_vm13 = vcmp.eq.f32.partialorder %v1289_v8, 8.507059e+37 }
 0x4ca   :  { %v1986_v27 = vpop.eup %1985 }
 0x4cb   :  { %v1264_v29 = vadd.f32 1.0, %v1986_v27 }
 0x4cc   :  { %v1988_v32 = vpop.eup %1987 }
 0x4cd   :  { %v1990_v50 = vpop.eup %1989  ;;  %v1266_v52 = vmul.f32 %v1988_v32, %v1262_v10  ;;  %1991 = vrcp.f32 %v1264_v29  ;;  %vm1271_vm6 = vweird.f32 %v1988_v32  ;;  %v1306_v35 = vand.u32 2147483648, %v1264_v29 }
 0x4ce   :  { %v1281_v58 = vmul.f32 %v1990_v50, %v1263_v11  ;;  %1993 = vtanh.f32 %v1252_v42  ;;  %vm1286_vm7 = vweird.f32 %v1990_v50  ;;  %vm1272_vm10 = vmor %vm1270_vm8, %vm1271_vm6  ;;  %vm1300_vm15 = vweird.f32 %v1264_v29 }
 0x4cf   :  { %v1267_v1 = vsub.f32 1.0, %v1266_v52  ;;  %vm1287_vm11 = vmor %vm1285_vm9, %vm1286_vm7  ;;  %v1304_v4 = vand.u32 2147483647, %v1264_v29  ;;  %v1307_v55 = vor.u32 1.1754944e-38, %v1306_v35 }
 0x4d0   :  { %v1282_v22 = vsub.f32 1.0, %v1281_v58 }
 0x4d1   :  { %v1268_v44 = vmul.f32 %v1988_v32, %v1267_v1  ;;  %vm1305_vm1 = vcmp.eq.f32.partialorder %v1304_v4, 8.507059e+37 }
 0x4d2   :  { %v1283_v31 = vmul.f32 %v1990_v50, %v1282_v22 }
 0x4d3   :  { %v1992_v5 = vpop.eup %1991  ;;  %v1269_v0 = vadd.f32 %v1988_v32, %v1268_v44 }
 0x4d4   :  { %v1296_v25 = vmul.f32 %v1992_v5, %v1264_v29  ;;  %v1284_v60 = vadd.f32 %v1990_v50, %v1283_v31  ;;  %v1994_v18 = vpop.eup %1993  ;;  %vm1301_vm14 = vweird.f32 %v1992_v5  ;;  %v2748_v29 = vld [vmem:[#allocation25_spill] sm:$0xff] }
 0x4d5   :  { %v1273_v34 = vsel %vm1272_vm10, %v1988_v32, %v1269_v0  ;;  %vm1302_vm0 = vmor %vm1300_vm15, %vm1301_vm14 }
 0x4d6   :  { %v1297_v37 = vsub.f32 1.0, %v1296_v25  ;;  %v1278_v54 = vsel %vm1275_vm12, %v1277_v43, %v1273_v34  ;;  %v1288_v46 = vsel %vm1287_vm11, %v1990_v50, %v1284_v60 }
 0x4d7   :  { %v1293_v2 = vsel %vm1290_vm13, %v1292_v63, %v1288_v46  ;;  %v1312_v24 = vmul.f32 %v1994_v18, %v1278_v54 }
 0x4d8   :  { %v1311_v53 = vmul.f32 %v1293_v2, %v2649_v12  ;;  %v1298_v57 = vmul.f32 %v1992_v5, %v1297_v37 }
 0x4da   :  { %v2689_v39 = vadd.f32 %v1312_v24, %v1311_v53  ;;  %v1299_v40 = vadd.f32 %v1992_v5, %v1298_v57 }
 0x4dc   :  { %1995 = vtanh.f32 %v2689_v39  ;;  %v1303_v30 = vsel %vm1302_vm0, %v1992_v5, %v1299_v40 }
 0x4dd   :  { %v1308_v20 = vsel %vm1305_vm1, %v1307_v55, %v1303_v30 }
 0x4e2   :  { %v1996_v28 = vpop.eup %1995 }
 0x4e3   :  { %v1315_v17 = vmul.f32 %v1996_v28, %v1308_v20 }
 0x4e5   :  { %v1320_v16 = vpack.c.bf16 %v1315_v17, %v1315_v17 }
 0x4e7   :  { %1329 = vmatmul.bf16.vlgmr.msrb.gmra.mxu0 %v1320_v16  ;;  %1342 = vmatmul.bf16.vlgmr.msra.gmra.mxu1 %v1320_v16 }
 0x4e8   :  { %1355 = vmatmul.bf16.vlgmr.msrb.gmra.mxu2 %v1320_v16  ;;  %1368 = vmatmul.bf16.vlgmr.msrb.gmra.mxu3 %v1320_v16  ;;  %v1578_v16 = vld [vmem:[#allocation8 + $0x70] sm:$0xff] }
 0x564   :  { %v1330_v12 = vpop.f32.mrf.mxu0  ;;  %v1343_v45 = vpop.f32.mrf.mxu1 }
 0x565   :  { %v1373_v6 = vadd.f32 %v1330_v12, %v2745_v61  ;;  %v1374_v13 = vadd.f32 %v1343_v45, %v2746_v7  ;;  %v1577_v12 = vld [vmem:[#allocation8 + $0x68] sm:$0xff]  ;;  %v1576_v45 = vld [vmem:[#allocation8 + $0x60] sm:$0xff]  ;;  %v1575_v61 = vld [vmem:[#allocation8 + $0x58] sm:$0xff] }
 0x566   :  { %v1573_v7 = vld [vmem:[#allocation8 + $0x48] sm:$0xff] }
 0x567   :  { %v1833_v14 = vmul.f32 -1.442695, %v1373_v6  ;;  %v1834_v19 = vmul.f32 -1.442695, %v1374_v13  ;;  %v1574_v6 = vld [vmem:[#allocation8 + $0x50] sm:$0xff]  ;;  %v1572_v13 = vld [vmem:[#allocation8 + $0x40] sm:$0xff] }
 0x569   :  { %1997 = vpow2.f32 %v1833_v14  ;;  %v1571_v14 = vld [vmem:[#allocation8 + $0x38] sm:$0xff] }
 0x56a   :  { %1999 = vpow2.f32 %v1834_v19  ;;  %v1570_v19 = vld [vmem:[#allocation8 + $0x30] sm:$0xff] }
 0x56b   :  { %v1356_v21 = vpop.f32.mrf.mxu2  ;;  %v1369_v33 = vpop.f32.mrf.mxu3 }
 0x56c   :  { %v1375_v41 = vadd.f32 %v1356_v21, %v2747_v38  ;;  %v1332_v47 = vpop.f32.mrf.mxu0  ;;  %v1345_v48 = vpop.f32.mrf.mxu1  ;;  %v1376_v32 = vadd.f32 %v1369_v33, %v2748_v29  ;;  %v2749_v38 = vld [vmem:[#allocation14_spill] sm:$0xff] }
 0x56d   :  { %v2750_v47 = vld [vmem:[#allocation30_spill] sm:$0xff] }
 0x56e   :  { %v1835_v51 = vmul.f32 -1.442695, %v1375_v41 }
 0x56f   :  { %v1998_v56 = vpop.eup %1997 }
 0x570   :  { %v2000_v59 = vpop.eup %1999  ;;  %v1386_v62 = vadd.f32 1.0, %v1998_v56  ;;  %2001 = vpow2.f32 %v1835_v51  ;;  %v1569_v51 = vld [vmem:[#allocation8 + $0x28] sm:$0xff] }
 0x571   :  { %v1387_v3 = vadd.f32 1.0, %v2000_v59 }
 0x572   :  { %2003 = vrcp.f32 %v1386_v62  ;;  %v1400_v1 = vand.u32 2147483648, %v1386_v62  ;;  %v1398_v26 = vand.u32 2147483647, %v1386_v62  ;;  %vm1394_vm4 = vweird.f32 %v1386_v62 }
 0x573   :  { %2005 = vrcp.f32 %v1387_v3  ;;  %v1358_v10 = vpop.f32.mrf.mxu2  ;;  %v1371_v11 = vpop.f32.mrf.mxu3  ;;  %v1415_v22 = vand.u32 2147483648, %v1387_v3  ;;  %v1413_v49 = vand.u32 2147483647, %v1387_v3  ;;  %vm1409_vm5 = vweird.f32 %v1387_v3 }
 0x574   :  { %v1401_v0 = vor.u32 1.1754944e-38, %v1400_v1  ;;  %vm1399_vm8 = vcmp.eq.f32.partialorder %v1398_v26, 8.507059e+37  ;;  %v1566_v10 = vld [vmem:[#allocation8 + $0x10] sm:$0xff] }
 0x575   :  { %v1416_v43 = vor.u32 1.1754944e-38, %v1415_v22  ;;  %vm1414_vm9 = vcmp.eq.f32.partialorder %v1413_v49, 8.507059e+37 }
 0x576   :  { %v2002_v15 = vpop.eup %2001 }
 0x577   :  { %v1388_v23 = vadd.f32 1.0, %v2002_v15 }
 0x578   :  { %v2004_v27 = vpop.eup %2003 }
 0x579   :  { %v2006_v36 = vpop.eup %2005  ;;  %v1390_v42 = vmul.f32 %v2004_v27, %v1386_v62  ;;  %2007 = vrcp.f32 %v1388_v23  ;;  %vm1395_vm2 = vweird.f32 %v2004_v27  ;;  %v1430_v40 = vand.u32 2147483648, %v1388_v23  ;;  %v1568_v62 = vld [vmem:[#allocation8 + $0x20] sm:$0xff] }
 0x57a   :  { %v1405_v50 = vmul.f32 %v2006_v36, %v1387_v3  ;;  %2009 = vtanh.f32 %v1376_v32  ;;  %vm1410_vm3 = vweird.f32 %v2006_v36  ;;  %vm1396_vm6 = vmor %vm1394_vm4, %vm1395_vm2  ;;  %vm1424_vm11 = vweird.f32 %v1388_v23  ;;  %v1567_v3 = vld [vmem:[#allocation8 + $0x18] sm:$0xff] }
 0x57b   :  { %v1391_v52 = vsub.f32 1.0, %v1390_v42  ;;  %vm1411_vm7 = vmor %vm1409_vm5, %vm1410_vm3  ;;  %v1428_v35 = vand.u32 2147483647, %v1388_v23  ;;  %v1431_v30 = vor.u32 1.1754944e-38, %v1430_v40  ;;  %v1564_v42 = vld [vmem:[#allocation8] sm:$0xff] }
 0x57c   :  { %v1406_v58 = vsub.f32 1.0, %v1405_v50 }
 0x57d   :  { %v1392_v9 = vmul.f32 %v2004_v27, %v1391_v52  ;;  %vm1429_vm13 = vcmp.eq.f32.partialorder %v1428_v35, 8.507059e+37 }
 0x57e   :  { %v1407_v44 = vmul.f32 %v2006_v36, %v1406_v58 }
 0x57f   :  { %v2008_v31 = vpop.eup %2007  ;;  %v1393_v8 = vadd.f32 %v2004_v27, %v1392_v9 }
 0x580   :  { %v1420_v5 = vmul.f32 %v2008_v31, %v1388_v23  ;;  %v1408_v25 = vadd.f32 %v2006_v36, %v1407_v44  ;;  %v2010_v63 = vpop.eup %2009  ;;  %vm1425_vm10 = vweird.f32 %v2008_v31  ;;  %v1565_v23 = vld [vmem:[#allocation8 + $0x8] sm:$0xff] }
 0x581   :  { %v1397_v60 = vsel %vm1396_vm6, %v2004_v27, %v1393_v8  ;;  %vm1426_vm12 = vmor %vm1424_vm11, %vm1425_vm10  ;;  %v2751_v27 = vld [vmem:[#allocation27_spill] sm:$0xff]  ;;  %v2752_v8 = vld [vmem:[#allocation28_spill] sm:$0xff] }
 0x582   :  { %v1421_v34 = vsub.f32 1.0, %v1420_v5  ;;  %v1402_v18 = vsel %vm1399_vm8, %v1401_v0, %v1397_v60  ;;  %v1412_v37 = vsel %vm1411_vm7, %v2006_v36, %v1408_v25 }
 0x583   :  { %v1417_v54 = vsel %vm1414_vm9, %v1416_v43, %v1412_v37  ;;  %v1436_v46 = vmul.f32 %v2010_v63, %v1402_v18 }
 0x584   :  { %v1435_v2 = vmul.f32 %v1417_v54, %v2689_v39  ;;  %v1422_v24 = vmul.f32 %v2008_v31, %v1421_v34  ;;  %v1579_v39 = vld [vmem:[#allocation8 + $0x78] sm:$0xff] }
 0x585   :  { %1584 = vmatpush.msrb.mxu0 %v1579_v39 }
 0x586   :  { %v2697_v53 = vadd.f32 %v1436_v46, %v1435_v2  ;;  %v1423_v57 = vadd.f32 %v2008_v31, %v1422_v24 }
 0x587   :  { %1585 = vmatpush.msrb.mxu0 %v1578_v16 }
 0x588   :  { %2011 = vtanh.f32 %v2697_v53  ;;  %v1427_v4 = vsel %vm1426_vm12, %v2008_v31, %v1423_v57 }
 0x589   :  { %v1432_v28 = vsel %vm1429_vm13, %v1431_v30, %v1427_v4  ;;  %1586 = vmatpush.msrb.mxu0 %v1577_v12 }
 0x58b   :  { %1587 = vmatpush.msrb.mxu0 %v1576_v45 }
 0x58d   :  { %1588 = vmatpush.msrb.mxu0 %v1575_v61 }
 0x58e   :  { %v2012_v55 = vpop.eup %2011 }
 0x58f   :  { %v1439_v20 = vmul.f32 %v2012_v55, %v1432_v28  ;;  %1589 = vmatpush.msrb.mxu0 %v1574_v6 }
 0x591   :  { %v1444_v17 = vpack.c.bf16 %v1439_v20, %v1439_v20  ;;  %1590 = vmatpush.msrb.mxu0 %v1573_v7 }
 0x593   :  { %1453 = vmatmul.bf16.vlgmr.msra.gmra.mxu0 %v1444_v17  ;;  %1466 = vmatmul.bf16.vlgmr.msrb.gmra.mxu1 %v1444_v17 }
 0x594   :  { %1479 = vmatmul.bf16.vlgmr.msra.gmra.mxu2 %v1444_v17  ;;  %1492 = vmatmul.bf16.vlgmr.msra.gmra.mxu3 %v1444_v17 }
 0x595   :  { %1591 = vmatpush.msrb.mxu0 %v1572_v13 }
 0x597   :  { %1592 = vmatpush.msrb.mxu0 %v1571_v14 }
 0x599   :  { %1593 = vmatpush.msrb.mxu0 %v1570_v19 }
 0x59b   :  { %1594 = vmatpush.msrb.mxu0 %v1569_v51 }
 0x59d   :  { %1595 = vmatpush.msrb.mxu0 %v1568_v62 }
 0x59f   :  { %1596 = vmatpush.msrb.mxu0 %v1567_v3 }
 0x5a1   :  { %1597 = vmatpush.msrb.mxu0 %v1566_v10 }
 0x5a3   :  { %1598 = vmatpush.msrb.mxu0 %v1565_v23 }
 0x5a5   :  { %1599 = vmatpush.msrb.mxu0 %v1564_v42 }
 0x610   :  { %v1454_v21 = vpop.f32.mrf.mxu0  ;;  %v1467_v33 = vpop.f32.mrf.mxu1 }
 0x611   :  { %v1497_v41 = vadd.f32 %v1454_v21, %v2749_v38  ;;  %v1498_v48 = vadd.f32 %v1467_v33, %v2750_v47 }
 0x613   :  { %v1836_v56 = vmul.f32 -1.442695, %v1497_v41  ;;  %v1837_v59 = vmul.f32 -1.442695, %v1498_v48 }
 0x615   :  { %2013 = vpow2.f32 %v1836_v56 }
 0x616   :  { %2015 = vpow2.f32 %v1837_v59 }
 0x617   :  { %v1480_v11 = vpop.f32.mrf.mxu2  ;;  %v1493_v15 = vpop.f32.mrf.mxu3 }
 0x618   :  { %v1499_v29 = vadd.f32 %v1480_v11, %v2751_v27  ;;  %v1456_v32 = vpop.f32.mrf.mxu0  ;;  %v1469_v36 = vpop.f32.mrf.mxu1  ;;  %v1500_v5 = vadd.f32 %v1493_v15, %v2752_v8 }
 0x61a   :  { %v1838_v50 = vmul.f32 -1.442695, %v1499_v29 }
 0x61b   :  { %v2014_v52 = vpop.eup %2013 }
 0x61c   :  { %v2016_v58 = vpop.eup %2015  ;;  %v1510_v1 = vadd.f32 1.0, %v2014_v52  ;;  %2017 = vpow2.f32 %v1838_v50 }
 0x61d   :  { %v1511_v22 = vadd.f32 1.0, %v2016_v58 }
 0x61e   :  { %2019 = vrcp.f32 %v1510_v1  ;;  %v1524_v34 = vand.u32 2147483648, %v1510_v1  ;;  %v1522_v54 = vand.u32 2147483647, %v1510_v1  ;;  %vm1518_vm0 = vweird.f32 %v1510_v1 }
 0x61f   :  { %2021 = vrcp.f32 %v1511_v22  ;;  %v1482_v9 = vpop.f32.mrf.mxu2  ;;  %v1495_v26 = vpop.f32.mrf.mxu3  ;;  %v1539_v18 = vand.u32 2147483648, %v1511_v22  ;;  %v1537_v2 = vand.u32 2147483647, %v1511_v22  ;;  %vm1533_vm1 = vweird.f32 %v1511_v22 }
 0x620   :  { %v1525_v35 = vor.u32 1.1754944e-38, %v1524_v34  ;;  %vm1523_vm4 = vcmp.eq.f32.partialorder %v1522_v54, 8.507059e+37 }
 0x621   :  { %v1540_v30 = vor.u32 1.1754944e-38, %v1539_v18  ;;  %vm1538_vm5 = vcmp.eq.f32.partialorder %v1537_v2, 8.507059e+37 }
 0x622   :  { %v2018_v44 = vpop.eup %2017 }
 0x623   :  { %v1512_v49 = vadd.f32 1.0, %v2018_v44 }
 0x624   :  { %v2020_v31 = vpop.eup %2019 }
 0x625   :  { %v2022_v0 = vpop.eup %2021  ;;  %v1514_v25 = vmul.f32 %v2020_v31, %v1510_v1  ;;  %2023 = vrcp.f32 %v1512_v49  ;;  %vm1519_vm14 = vweird.f32 %v2020_v31  ;;  %v1554_v13 = vand.u32 2147483648, %v1512_v49 }
 0x626   :  { %v1529_v43 = vmul.f32 %v2022_v0, %v1511_v22  ;;  %2025 = vtanh.f32 %v1500_v5  ;;  %vm1534_vm15 = vweird.f32 %v2022_v0  ;;  %vm1520_vm2 = vmor %vm1518_vm0, %vm1519_vm14  ;;  %vm1548_vm7 = vweird.f32 %v1512_v49 }
 0x627   :  { %v1515_v60 = vsub.f32 1.0, %v1514_v25  ;;  %vm1535_vm3 = vmor %vm1533_vm1, %vm1534_vm15  ;;  %v1552_v14 = vand.u32 2147483647, %v1512_v49  ;;  %v1555_v21 = vor.u32 1.1754944e-38, %v1554_v13 }
 0x628   :  { %v1530_v63 = vsub.f32 1.0, %v1529_v43 }
 0x629   :  { %v1516_v37 = vmul.f32 %v2020_v31, %v1515_v60  ;;  %vm1553_vm9 = vcmp.eq.f32.partialorder %v1552_v14, 8.507059e+37 }
 0x62a   :  { %v1531_v46 = vmul.f32 %v2022_v0, %v1530_v63 }
 0x62b   :  { %v2024_v24 = vpop.eup %2023  ;;  %v1517_v57 = vadd.f32 %v2020_v31, %v1516_v37 }
 0x62c   :  { %v1544_v40 = vmul.f32 %v2024_v24, %v1512_v49  ;;  %v1532_v4 = vadd.f32 %v2022_v0, %v1531_v46  ;;  %v2026_v28 = vpop.eup %2025  ;;  %vm1549_vm6 = vweird.f32 %v2024_v24 }
 0x62d   :  { %v1521_v55 = vsel %vm1520_vm2, %v2020_v31, %v1517_v57  ;;  %vm1550_vm8 = vmor %vm1548_vm7, %vm1549_vm6 }
 0x62e   :  { %v1545_v20 = vsub.f32 1.0, %v1544_v40  ;;  %v1526_v17 = vsel %vm1523_vm4, %v1525_v35, %v1521_v55  ;;  %v1536_v39 = vsel %vm1535_vm3, %v2022_v0, %v1532_v4 }
 0x62f   :  { %v1541_v16 = vsel %vm1538_vm5, %v1540_v30, %v1536_v39  ;;  %v1560_v12 = vmul.f32 %v2026_v28, %v1526_v17 }
 0x630   :  { %v1559_v45 = vmul.f32 %v1541_v16, %v2697_v53  ;;  %v1546_v61 = vmul.f32 %v2024_v24, %v1545_v20  ;;  %v1900_v53 = vld [vmem:[%s2715_s4] ss:$0 sm:$0xff] }
 0x632   :  { %v1561_v6 = vadd.f32 %v1560_v12, %v1559_v45  ;;  %v1547_v7 = vadd.f32 %v2024_v24, %v1546_v61 }
 0x634   :  { %2027 = vtanh.f32 %v1561_v6  ;;  %v1551_v19 = vsel %vm1550_vm8, %v2024_v24, %v1547_v7 }
 0x635   :  { %v1556_v38 = vsel %vm1553_vm9, %v1555_v21, %v1551_v19 }
 0x63a   :  { %v2028_v33 = vpop.eup %2027 }
 0x63b   :  { %v1563_v41 = vmul.f32 %v2028_v33, %v1556_v38 }
 0x63d   :  { %1600 = vmatmul.f32.vlgmr.msrb.gmra.mxu0 %v1563_v41 }
 0x6ba   :  { %v1601_v47 = vpop.f32.mrf.mxu0 }
 0x6bb   :  { %v1602_v48 = vadd.f32 %v1900_v53, %v1601_v47 }
 0x6bd   :  { %1604 = vst [vmem:[#allocation9] sm:$0xff] %v1602_v48 }
 0x6be   :  { %1615 = dma.vmem_to_hbm [thread:$0]  %s1611_s27, 128, %s1613_s30, [#allocation5]  }
 0x6bf   :  { %2129 = dma.done.wait [#allocation5], 128  }
 0x6c0   :  { %2130 = vsyncadd [#allocation5], 4294967168 }
 0x6c1   :  { %1620 = vsyncpa [#allocation4], 1 }
 0x6c2   :  { %1621 = vsyncpa [#allocation7], 1 }
 0x6c3   :  { %1622 = vsyncpa [#allocation5], 1 }

</bundles_post_ra>
